<compile_context>
chip_gen: v7x
topology: tpu7x:2x2x1
jax: 0.10.0
libtpu: 0.0.40
codegen_flags: <defaults>
</compile_context>

<pallas_src>
from functools import partial

import jax
import jax.numpy as jnp
from jax.experimental import pallas as pl
from jax.experimental.pallas import tpu as pltpu

EPS = 1e-6
LAYER_SCALE_INIT = 1e-6
ACT_DTYPE = jnp.bfloat16     # inter-kernel activation dtype (HBM traffic)
MM_DTYPE = jnp.bfloat16      # MXU operand dtype (f32 accumulation)
HID_CHUNK = 1024             # 4C hidden-dim chunk width inside the block tail


# ----------------------------------------------------------------------------- #
# Generation-aware VMEM / tiling policy
# ----------------------------------------------------------------------------- #
def _tpu_vmem_bytes():
    try:
        info = pltpu.get_tpu_info()
        for name in ("vmem_capacity_bytes", "vmem_size_bytes", "vmem_bytes"):
            v = getattr(info, name, None)
            if v:
                return int(v)
    except Exception:
        pass
    return 128 * 1024 * 1024          # v5e/v6e default if the query is unavailable


_VMEM_BYTES = _tpu_vmem_bytes()
_BIG_VMEM = _VMEM_BYTES >= 96 * 1024 * 1024     # v5e/v6e: 128 MiB/TC; v7x: 64 MiB/TC
VMEM_LIMIT = int(min(_VMEM_BYTES * 3 // 4, 96 * 1024 * 1024))
_MM_TOKEN_CAP = 1024 if _BIG_VMEM else 512      # stem / downsample matmul token tile


def _tail_token_cap(c):
    # block-tail token tile: bigger on 128-MiB parts, smaller for the C>=512 stages
    # on v7x (weights + chunked GELU intermediate must fit 64 MiB).
    if _BIG_VMEM:
        return 1024 if c <= 256 else 512
    return 512 if c <= 256 else 256


def _token_tile(n, cap):
    # Largest power-of-two divisor of n that is <= cap (>= 8 when possible);
    # otherwise the largest divisor <= cap (never returns an oversized full-N block).
    cap = max(8, min(cap, n))
    t = 8
    while t * 2 <= cap:
        t *= 2
    while t >= 8:
        if n % t == 0:
            return t
        t //= 2
    for t in range(cap, 0, -1):
        if n % t == 0:
            return t
    return n


def _cparams(n_parallel=1, vmem=None):
    return pltpu.CompilerParams(dimension_semantics=("parallel",) * n_parallel,
                                vmem_limit_bytes=vmem)


# ----------------------------------------------------------------------------- #
# In-kernel math helpers (all f32)
# ----------------------------------------------------------------------------- #
def _gelu(x):
    # tanh-form GELU: tanh lowers to the EUP slot (free while the MXU/VPU work),
    # vs ~12 VALU ops/elem for the erf polynomial.  Deviation from torch.nn.GELU's
    # exact erf is ~1e-3 absolute, below the bf16 activation noise floor.
    c = 0.7978845608028654  # sqrt(2/pi)
    return 0.5 * x * (1.0 + jnp.tanh(c * (x + 0.044715 * x * x * x)))


def _layernorm_math(x, w, b):
    mu = jnp.mean(x, axis=-1, keepdims=True)
    xc = x - mu
    var = jnp.mean(xc * xc, axis=-1, keepdims=True)
    return xc * jax.lax.rsqrt(var + EPS) * w + b


# ----------------------------------------------------------------------------- #
# Pallas kernels
# ----------------------------------------------------------------------------- #
def _stem_matmul_ln_kernel(x_ref, w_ref, b_ref, lnw_ref, lnb_ref, o_ref):
    # stem: Conv(4x4/s4) as matmul + bias, fused with the channels_first LayerNorm
    x = x_ref[...].astype(MM_DTYPE)
    o = jnp.dot(x, w_ref[...], preferred_element_type=jnp.float32) + b_ref[...]
    o_ref[...] = _layernorm_math(o, lnw_ref[...], lnb_ref[...]).astype(o_ref.dtype)


def _down_ln_matmul_kernel(x_ref, lnw_ref, lnb_ref, w_ref, b_ref, o_ref):
    # downsample: per-pixel LayerNorm fused into the 2x2/s2 patchify matmul.
    # x_ref: (TN, 4C) im2col rows; w_ref: (4, C, Co) bf16; LN applied to each of the
    # four C-wide pixel slices, then 4 accumulated MXU matmuls (same FLOPs as one).
    x = x_ref[...].astype(jnp.float32)
    lnw = lnw_ref[...]
    lnb = lnb_ref[...]
    C = lnw.shape[-1]
    Co = b_ref.shape[-1]
    acc = jnp.zeros((x.shape[0], Co), jnp.float32)
    for g in range(4):
        xg = x[:, g * C:(g + 1) * C]
        t = _layernorm_math(xg, lnw, lnb).astype(MM_DTYPE)
        acc = acc + jnp.dot(t, w_ref[g], preferred_element_type=jnp.float32)
    o_ref[...] = (acc + b_ref[...]).astype(o_ref.dtype)


def _dwconv7_kernel(x_ref, w_ref, b_ref, o_ref, *, H, W):
    # 7x7 depthwise conv, padding=3.  x_ref: (H, W, C) UN-padded block; the zero
    # halo is built in-kernel (no HBM pad round trip).  w_ref: (49, C) f32.
    x = x_ref[...].astype(jnp.float32)
    C = x.shape[-1]
    wv = w_ref[...]                                        # loaded once, indexed in-register
    zrow = jnp.zeros((3, W, C), jnp.float32)
    xh = jnp.concatenate([zrow, x, zrow], axis=0)          # (H+6, W, C): major-axis concat

    # 7 W-shifted slabs, computed once and shared across the 7 dy offsets.
    shifted = []
    if W % 8 == 0:
        # XLU circular roll + border mask: keeps the VPU free for the 49 FMAs and
        # avoids 42 misaligned sublane slice copies.
        wiota = jax.lax.broadcasted_iota(jnp.int32, (1, W, 1), 1)
        for dx in range(7):
            s = xh if dx == 3 else pltpu.roll(xh, shift=(3 - dx) % W, axis=1)
            lo, hi = max(0, 3 - dx), W - max(0, dx - 3)
            if lo > 0 or hi < W:
                s = jnp.where((wiota >= lo) & (wiota < hi), s, 0.0)
            shifted.append(s)
    else:
        # small / non-8-multiple W: zero-pad W in-kernel and slice (7 slabs, not 49).
        zcol = jnp.zeros((H + 6, 3, C), jnp.float32)
        xw = jnp.concatenate([zcol, xh, zcol], axis=1)     # (H+6, W+6, C)
        for dx in range(7):
            shifted.append(xw[:, dx:dx + W, :])

    acc = jnp.zeros((H, W, C), jnp.float32)
    for dy in range(7):
        base = dy * 7
        for dx in range(7):
            acc = acc + shifted[dx][dy:dy + H] * wv[base + dx]   # H slices are tile-aligned
    o_ref[...] = (acc + b_ref[...]).astype(o_ref.dtype)


def _gcc_block_kernel(x_ref, peh_ref, wh_ref, bh_ref, pew_ref, ww_ref, bw_ref, o_ref,
                      *, H, W, c2):
    # Fused gcc_cvx depthwise step: the first c2 channels get the H-circular conv,
    # the last c2 channels the W-circular conv.  Reads x once, writes y once; PE add
    # and circular wrap are done in-kernel (no HBM split / pre-wrap / concat).
    x = x_ref[...].astype(jnp.float32)                     # (H, W, C)

    # ---- H half: circular depthwise conv along H (outer axis) ----
    x1 = x[:, :, :c2]
    xpe1 = x1 + peh_ref[...][:, None, :]                   # peh: (H, c2)
    xc1 = jnp.concatenate([xpe1, xpe1[:H - 1]], axis=0) if H > 1 else xpe1
    wh = wh_ref[...]
    acc1 = xc1[0:H] * wh[0]
    for k in range(1, H):
        acc1 = acc1 + xc1[k:k + H] * wh[k]
    o1 = acc1 + bh_ref[...]

    # ---- W half: circular depthwise conv along W (sublane axis) ----
    x2 = x[:, :, c2:]
    xpe2 = x2 + pew_ref[...][None, :, :]                   # pew: (W, c2)
    ww = ww_ref[...]
    if W % 8 == 0:
        # exact circular wrap via XLU rolls - no wrapped (H, 2W-1, c2) slab at all
        acc2 = xpe2 * ww[0]
        for k in range(1, W):
            acc2 = acc2 + pltpu.roll(xpe2, shift=W - k, axis=1) * ww[k]
    else:
        xc2 = jnp.concatenate([xpe2, xpe2[:, :W - 1, :]], axis=1) if W > 1 else xpe2
        acc2 = xc2[:, 0:W, :] * ww[0]
        for k in range(1, W):
            acc2 = acc2 + xc2[:, k:k + W, :] * ww[k]
    o2 = acc2 + bw_ref[...]

    o_ref[...] = jnp.concatenate([o1, o2], axis=-1).astype(o_ref.dtype)


def _block_tail_core(y_ref, r_ref, lnw_ref, lnb_ref, w1_ref, b1_ref,
                     w2_ref, b2_ref, g_ref):
    y = y_ref[...].astype(jnp.float32)
    C = y.shape[-1]
    t = _layernorm_math(y, lnw_ref[...], lnb_ref[...]).astype(MM_DTYPE)
    H4 = w1_ref.shape[1]
    acc = jnp.zeros((y.shape[0], C), jnp.float32)
    # Chunk the 4C hidden dim: smaller f32 GELU intermediate, better MXU/VPU overlap.
    for c0 in range(0, H4, HID_CHUNK):
        c1 = min(c0 + HID_CHUNK, H4)
        h = jnp.dot(t, w1_ref[:, c0:c1],
                    preferred_element_type=jnp.float32) + b1_ref[:, c0:c1]
        h = _gelu(h)
        acc = acc + jnp.dot(h.astype(MM_DTYPE), w2_ref[c0:c1, :],
                            preferred_element_type=jnp.float32)
    o = acc + b2_ref[...]
    return r_ref[...].astype(jnp.float32) + g_ref[...] * o


def _block_tail_kernel(y_ref, r_ref, lnw_ref, lnb_ref, w1_ref, b1_ref,
                       w2_ref, b2_ref, g_ref, o_ref):
    out = _block_tail_core(y_ref, r_ref, lnw_ref, lnb_ref, w1_ref, b1_ref,
                           w2_ref, b2_ref, g_ref)
    o_ref[...] = out.astype(o_ref.dtype)


def _block_tail_ln_kernel(y_ref, r_ref, lnw_ref, lnb_ref, w1_ref, b1_ref,
                          w2_ref, b2_ref, g_ref, ow_ref, ob_ref, o_ref, oln_ref):
    # last block of a stage: also emit the (channels_first) stage-output norm (bf16)
    out = _block_tail_core(y_ref, r_ref, lnw_ref, lnb_ref, w1_ref, b1_ref,
                           w2_ref, b2_ref, g_ref)
    o_ref[...] = out.astype(o_ref.dtype)
    oln_ref[...] = _layernorm_math(out, ow_ref[...], ob_ref[...]).astype(oln_ref.dtype)


# ----------------------------------------------------------------------------- #
# Pallas wrappers
# ----------------------------------------------------------------------------- #
def _im2col(x, k):
    # TODO(synk): move this patch-major rearrange in-kernel (strided loads) to drop
    # one activation HBM round trip per stage boundary.
    B, H, W, C = x.shape
    Ho, Wo = H // k, W // k
    patches = (x.reshape(B, Ho, k, Wo, k, C)
                 .transpose(0, 1, 3, 2, 4, 5)
                 .reshape(B * Ho * Wo, k * k * C))
    return patches, (B, Ho, Wo)


def stem_conv(x, w, b, ln_w, ln_b):
    patches, (B, Ho, Wo) = _im2col(x, 4)
    N, K = patches.shape
    Co = w.shape[1]
    TN = _token_tile(N, _MM_TOKEN_CAP)
    y = pl.pallas_call(
        _stem_matmul_ln_kernel,
        out_shape=jax.ShapeDtypeStruct((N, Co), ACT_DTYPE),
        grid=(N // TN,),
        in_specs=[
            pl.BlockSpec((TN, K), lambda i: (i, 0)),
            pl.BlockSpec((K, Co), lambda i: (0, 0)),
            pl.BlockSpec((1, Co), lambda i: (0, 0)),
            pl.BlockSpec((1, Co), lambda i: (0, 0)),
            pl.BlockSpec((1, Co), lambda i: (0, 0)),
        ],
        out_specs=pl.BlockSpec((TN, Co), lambda i: (i, 0)),
        compiler_params=_cparams(1, VMEM_LIMIT),
    )(patches, w, b.reshape(1, Co), ln_w.reshape(1, Co), ln_b.reshape(1, Co))
    return y.reshape(B, Ho, Wo, Co)


def downsample_conv(x, ln_w, ln_b, w, b):
    # channels_first LayerNorm fused into the 2x2/s2 patchify matmul
    C = x.shape[-1]
    patches, (B, Ho, Wo) = _im2col(x, 2)
    N, K = patches.shape
    Co = w.shape[1]
    w4 = w.reshape(4, C, Co)
    TN = _token_tile(N, _MM_TOKEN_CAP)
    y = pl.pallas_call(
        _down_ln_matmul_kernel,
        out_shape=jax.ShapeDtypeStruct((N, Co), ACT_DTYPE),
        grid=(N // TN,),
        in_specs=[
            pl.BlockSpec((TN, K), lambda i: (i, 0)),
            pl.BlockSpec((1, C), lambda i: (0, 0)),
            pl.BlockSpec((1, C), lambda i: (0, 0)),
            pl.BlockSpec((4, C, Co), lambda i: (0, 0, 0)),
            pl.BlockSpec((1, Co), lambda i: (0, 0)),
        ],
        out_specs=pl.BlockSpec((TN, Co), lambda i: (i, 0)),
        compiler_params=_cparams(1, VMEM_LIMIT),
    )(patches, ln_w.reshape(1, C), ln_b.reshape(1, C), w4, b.reshape(1, Co))
    return y.reshape(B, Ho, Wo, Co)


def dwconv7(x, w, b):
    B, H, W, C = x.shape
    # channel-axis grid blocking (when lane-dense) gives >B grid steps for the big
    # stages so the input DMA actually overlaps compute on v7x's two TensorCores.
    CB = 128 if (C % 128 == 0 and C > 128) else C
    # TODO(synk): add an H-tile grid axis with halo blocks for very large feature maps.
    return pl.pallas_call(
        partial(_dwconv7_kernel, H=H, W=W),
        out_shape=jax.ShapeDtypeStruct((B, H, W, C), ACT_DTYPE),
        grid=(B, C // CB),
        in_specs=[
            pl.BlockSpec((None, H, W, CB), lambda bb, cc: (bb, 0, 0, cc)),
            pl.BlockSpec((49, CB), lambda bb, cc: (0, cc)),
            pl.BlockSpec((1, CB), lambda bb, cc: (0, cc)),
        ],
        out_specs=pl.BlockSpec((None, H, W, CB), lambda bb, cc: (bb, 0, 0, cc)),
        compiler_params=_cparams(2, VMEM_LIMIT),
    )(x, w, b.reshape(1, C))


def _interp1d_align_corners(v, out_size):
    # v: (in_size, C); linear interpolation along axis 0, align_corners=True
    in_size = v.shape[0]
    scale = 0.0 if (out_size == 1 or in_size == 1) else (in_size - 1) / (out_size - 1)
    pos = jnp.arange(out_size, dtype=jnp.float32) * scale
    lo = jnp.floor(pos).astype(jnp.int32)
    hi = jnp.minimum(lo + 1, in_size - 1)
    frac = (pos - lo.astype(jnp.float32))[:, None]
    return v[lo] * (1.0 - frac) + v[hi] * frac


def gcc_block_conv(x, ph, pw):
    # Fused gcc depthwise step (H-circular on channels [:C/2], W-circular on [C/2:])
    # with instance-size bilinear(align_corners) interpolation of kernels and PEs.
    B, H, W, C = x.shape
    c2 = C // 2
    wh = _interp1d_align_corners(ph['w'], H)      # (H, c2) f32
    peh = _interp1d_align_corners(ph['pe'], H)    # (H, c2) f32
    ww = _interp1d_align_corners(pw['w'], W)      # (W, c2) f32
    pew = _interp1d_align_corners(pw['pe'], W)    # (W, c2) f32
    return pl.pallas_call(
        partial(_gcc_block_kernel, H=H, W=W, c2=c2),
        out_shape=jax.ShapeDtypeStruct((B, H, W, C), ACT_DTYPE),
        grid=(B,),
        in_specs=[
            pl.BlockSpec((None, H, W, C), lambda bb: (bb, 0, 0, 0)),
            pl.BlockSpec((H, c2), lambda bb: (0, 0)),
            pl.BlockSpec((H, c2), lambda bb: (0, 0)),
            pl.BlockSpec((1, c2), lambda bb: (0, 0)),
            pl.BlockSpec((W, c2), lambda bb: (0, 0)),
            pl.BlockSpec((W, c2), lambda bb: (0, 0)),
            pl.BlockSpec((1, c2), lambda bb: (0, 0)),
        ],
        out_specs=pl.BlockSpec((None, H, W, C), lambda bb: (bb, 0, 0, 0)),
        compiler_params=_cparams(1, VMEM_LIMIT),
    )(x, peh, wh, ph['b'].reshape(1, c2), pew, ww, pw['b'].reshape(1, c2))


def block_tail(y, resid, p, out_ln=None):
    # fused LN -> pwconv1 -> GELU -> pwconv2 -> gamma -> residual add
    # (optionally also the channels_first stage-output norm as a 2nd output, bf16)
    # NOTE: the residual stream is carried bf16 through HBM (perf); switch ACT_DTYPE
    # to f32 if bit-level parity with the f32 PyTorch reference is required.
    B, H, W, C = y.shape
    N = B * H * W
    TN = _token_tile(N, _tail_token_cap(C))
    args = (
        y.reshape(N, C), resid.reshape(N, C),
        p['ln_w'].reshape(1, C), p['ln_b'].reshape(1, C),
        p['w1'], p['b1'].reshape(1, 4 * C),
        p['w2'], p['b2'].reshape(1, C),
        p['gamma'].reshape(1, C),
    )
    in_specs = [
        pl.BlockSpec((TN, C), lambda i: (i, 0)),
        pl.BlockSpec((TN, C), lambda i: (i, 0)),
        pl.BlockSpec((1, C), lambda i: (0, 0)),
        pl.BlockSpec((1, C), lambda i: (0, 0)),
        pl.BlockSpec((C, 4 * C), lambda i: (0, 0)),
        pl.BlockSpec((1, 4 * C), lambda i: (0, 0)),
        pl.BlockSpec((4 * C, C), lambda i: (0, 0)),
        pl.BlockSpec((1, C), lambda i: (0, 0)),
        pl.BlockSpec((1, C), lambda i: (0, 0)),
    ]
    cparams = _cparams(1, VMEM_LIMIT)

    if out_ln is None:
        out = pl.pallas_call(
            _block_tail_kernel,
            out_shape=jax.ShapeDtypeStruct((N, C), ACT_DTYPE),
            grid=(N // TN,),
            in_specs=in_specs,
            out_specs=pl.BlockSpec((TN, C), lambda i: (i, 0)),
            compiler_params=cparams,
        )(*args)
        return out.reshape(B, H, W, C), None

    out, out_n = pl.pallas_call(
        _block_tail_ln_kernel,
        out_shape=(jax.ShapeDtypeStruct((N, C), ACT_DTYPE),
                   jax.ShapeDtypeStruct((N, C), ACT_DTYPE)),
        grid=(N // TN,),
        in_specs=in_specs + [pl.BlockSpec((1, C), lambda i: (0, 0)),
                             pl.BlockSpec((1, C), lambda i: (0, 0))],
        out_specs=(pl.BlockSpec((TN, C), lambda i: (i, 0)),
                   pl.BlockSpec((TN, C), lambda i: (i, 0))),
        compiler_params=cparams,
    )(*args, out_ln['w'].reshape(1, C), out_ln['b'].reshape(1, C))
    return out.reshape(B, H, W, C), out_n.reshape(B, H, W, C)


# ----------------------------------------------------------------------------- #
# Parameter init (deterministic, synthetic; matches module shapes/init style)
# ----------------------------------------------------------------------------- #
def _normal(key, shape, std=0.02):
    return jax.random.normal(key, shape, jnp.float32) * std


def init_params(key, in_chans, depths, dims, stages_fs):
    keys = iter(jax.random.split(key, 512))
    p = {}
    p['stem_w'] = _normal(next(keys), (4 * 4 * in_chans, dims[0])).astype(MM_DTYPE)
    p['stem_b'] = jnp.zeros((dims[0],), jnp.float32)
    p['stem_ln_w'] = jnp.ones((dims[0],), jnp.float32)
    p['stem_ln_b'] = jnp.zeros((dims[0],), jnp.float32)

    p['down'] = []
    for i in range(3):
        p['down'].append({
            'ln_w': jnp.ones((dims[i],), jnp.float32),
            'ln_b': jnp.zeros((dims[i],), jnp.float32),
            'w': _normal(next(keys), (2 * 2 * dims[i], dims[i + 1])).astype(MM_DTYPE),
            'b': jnp.zeros((dims[i + 1],), jnp.float32),
        })

    p['stages'] = []
    p['kinds'] = []
    for i in range(4):
        blocks, kinds = [], []
        dim = dims[i]
        for j in range(depths[i]):
            is_gcc = (i >= 2) and (2 * depths[i] // 3 < j + 1)
            bp = {
                'ln_w': jnp.ones((dim,), jnp.float32),
                'ln_b': jnp.zeros((dim,), jnp.float32),
                'w1': _normal(next(keys), (dim, 4 * dim)).astype(MM_DTYPE),
                'b1': jnp.zeros((4 * dim,), jnp.float32),
                'w2': _normal(next(keys), (4 * dim, dim)).astype(MM_DTYPE),
                'b2': jnp.zeros((dim,), jnp.float32),
                'gamma': jnp.full((dim,), LAYER_SCALE_INIT, jnp.float32),
            }
            if is_gcc:
                c2, mk = dim // 2, stages_fs[i]
                bp['gcc_h'] = {'w': _normal(next(keys), (mk, c2)),
                               'pe': _normal(next(keys), (mk, c2)),
                               'b': jnp.zeros((c2,), jnp.float32)}
                bp['gcc_w'] = {'w': _normal(next(keys), (mk, c2)),
                               'pe': _normal(next(keys), (mk, c2)),
                               'b': jnp.zeros((c2,), jnp.float32)}
            else:
                bp['dw_w'] = _normal(next(keys), (49, dim))
                bp['dw_b'] = jnp.zeros((dim,), jnp.float32)
            blocks.append(bp)
            kinds.append('gcc' if is_gcc else 'block')
        p['stages'].append(blocks)
        p['kinds'].append(kinds)

    p['out_norms'] = [{'w': jnp.ones((dims[i],), jnp.float32),
                       'b': jnp.zeros((dims[i],), jnp.float32)} for i in range(4)]
    return p


# ----------------------------------------------------------------------------- #
# Forward pass (mirrors _ConvNeXt_GCC.forward_features)
# ----------------------------------------------------------------------------- #
def convnext_gcc_forward(params, x_nchw):
    x = jnp.transpose(x_nchw, (0, 2, 3, 1)).astype(ACT_DTYPE)   # NCHW -> NHWC bf16
    outs = []
    for i in range(4):
        if i == 0:
            x = stem_conv(x, params['stem_w'], params['stem_b'],
                          params['stem_ln_w'], params['stem_ln_b'])
        else:
            d = params['down'][i - 1]
            x = downsample_conv(x, d['ln_w'], d['ln_b'], d['w'], d['b'])

        blocks = params['stages'][i]
        kinds = params['kinds'][i]
        n_out = params['out_norms'][i]
        for j, (bp, kind) in enumerate(zip(blocks, kinds)):
            if kind == 'block':
                y = dwconv7(x, bp['dw_w'], bp['dw_b'])
            else:   # gcc_cvx_Block: fused H-wise & W-wise circular depthwise conv
                y = gcc_block_conv(x, bp['gcc_h'], bp['gcc_w'])
            is_last = (j == len(blocks) - 1)
            x, x_out = block_tail(y, x, bp, out_ln=n_out if is_last else None)
            if is_last:
                # NHWC -> NCHW; stage output is bf16 on the wire, returned as f32
                outs.append(jnp.transpose(x_out, (0, 3, 1, 2)).astype(jnp.float32))
    return tuple(outs)


# ----------------------------------------------------------------------------- #
if __name__ == "__main__":
    key = jax.random.PRNGKey(0)
    k_params, k_x = jax.random.split(key)

    in_chans = 3
    depths = [1, 1, 2, 1]          # small synthetic config (module default [3,3,9,3])
    dims = [16, 32, 64, 128]       # small synthetic config (module default [96,...])
    stages_fs = [56, 28, 14, 7]    # meta kernel sizes (hardcoded in the module)

    params = init_params(k_params, in_chans, depths, dims, stages_fs)
    x = jax.random.normal(k_x, (2, in_chans, 64, 64), jnp.float32)   # NCHW, like PyTorch

    outs = convnext_gcc_forward(params, x)
    outs = jax.block_until_ready(outs)

    expected = [(2, dims[0], 16, 16), (2, dims[1], 8, 8),
                (2, dims[2], 4, 4), (2, dims[3], 2, 2)]
    for o, e in zip(outs, expected):
        assert o.shape == e, (o.shape, e)
        assert bool(jnp.all(jnp.isfinite(o)))

    print("KERNEL_OK")
</pallas_src>

<mosaic_0001>
module attributes {stable_mosaic.version = 11 : i64} {
  func.func @_stem_matmul_ln_kernel(%arg0: i32, %arg1: memref<512x48xbf16, #tpu.memory_space<vmem>>, %arg2: memref<48x16xbf16, #tpu.memory_space<vmem>>, %arg3: memref<1x16xf32, #tpu.memory_space<vmem>>, %arg4: memref<1x16xf32, #tpu.memory_space<vmem>>, %arg5: memref<1x16xf32, #tpu.memory_space<vmem>>, %arg6: memref<512x16xbf16, #tpu.memory_space<vmem>>) attributes {dimension_semantics = [#tpu.dimension_semantics<parallel>], iteration_bounds = array<i64: 1>, scalar_prefetch = 0 : i64, scratch_operands = 0 : i64, tpu.core_type = #tpu.core_type<tc>, window_params = [{transform_indices = @transform_0, window_bounds = array<i64: 512, 48>}, {pipeline_mode = #tpu.pipeline_mode<synchronous>, transform_indices = @transform_1, window_bounds = array<i64: 48, 16>}, {pipeline_mode = #tpu.pipeline_mode<synchronous>, transform_indices = @transform_2, window_bounds = array<i64: 1, 16>}, {pipeline_mode = #tpu.pipeline_mode<synchronous>, transform_indices = @transform_3, window_bounds = array<i64: 1, 16>}, {pipeline_mode = #tpu.pipeline_mode<synchronous>, transform_indices = @transform_4, window_bounds = array<i64: 1, 16>}, {transform_indices = @transform_5, window_bounds = array<i64: 512, 16>}]} {
    %c0 = arith.constant 0 : index
    %c0_0 = arith.constant 0 : index
    %0 = vector.load %arg1[%c0, %c0_0] : memref<512x48xbf16, #tpu.memory_space<vmem>>, vector<512x48xbf16>
    %c0_1 = arith.constant 0 : index
    %c0_2 = arith.constant 0 : index
    %1 = vector.load %arg2[%c0_1, %c0_2] : memref<48x16xbf16, #tpu.memory_space<vmem>>, vector<48x16xbf16>
    %cst = arith.constant dense<0.000000e+00> : vector<512x16xf32>
    %2 = tpu.matmul %0, %1, %cst {dimension_numbers = #tpu.dot_dimension_numbers<[1], [0], [0], [1], [0, 0, 1, 1], [], []>} : vector<512x48xbf16>, vector<48x16xbf16>, vector<512x16xf32> -> vector<512x16xf32>
    %c0_3 = arith.constant 0 : index
    %c0_4 = arith.constant 0 : index
    %3 = vector.load %arg3[%c0_3, %c0_4] : memref<1x16xf32, #tpu.memory_space<vmem>>, vector<1x16xf32>
    %4 = vector.broadcast %3 : vector<1x16xf32> to vector<512x16xf32>
    %5 = arith.addf %2, %4 : vector<512x16xf32>
    %c0_5 = arith.constant 0 : index
    %c0_6 = arith.constant 0 : index
    %6 = vector.load %arg4[%c0_5, %c0_6] : memref<1x16xf32, #tpu.memory_space<vmem>>, vector<1x16xf32>
    %c0_7 = arith.constant 0 : index
    %c0_8 = arith.constant 0 : index
    %7 = vector.load %arg5[%c0_7, %c0_8] : memref<1x16xf32, #tpu.memory_space<vmem>>, vector<1x16xf32>
    %cst_9 = arith.constant dense<0.000000e+00> : vector<512xf32>
    %8 = vector.multi_reduction <add>, %5, %cst_9 [1] : vector<512x16xf32> to vector<512xf32>
    %9 = vector.shape_cast %8 : vector<512xf32> to vector<512x1xf32>
    %cst_10 = arith.constant 1.600000e+01 : f32
    %10 = vector.broadcast %cst_10 : f32 to vector<512x1xf32>
    %11 = arith.divf %9, %10 : vector<512x1xf32>
    %12 = vector.broadcast %11 : vector<512x1xf32> to vector<512x16xf32>
    %13 = arith.subf %5, %12 : vector<512x16xf32>
    %14 = arith.mulf %13, %13 : vector<512x16xf32>
    %cst_11 = arith.constant dense<0.000000e+00> : vector<512xf32>
    %15 = vector.multi_reduction <add>, %14, %cst_11 [1] : vector<512x16xf32> to vector<512xf32>
    %16 = vector.shape_cast %15 : vector<512xf32> to vector<512x1xf32>
    %cst_12 = arith.constant 1.600000e+01 : f32
    %17 = vector.broadcast %cst_12 : f32 to vector<512x1xf32>
    %18 = arith.divf %16, %17 : vector<512x1xf32>
    %cst_13 = arith.constant 9.99999997E-7 : f32
    %19 = vector.broadcast %cst_13 : f32 to vector<512x1xf32>
    %20 = arith.addf %18, %19 : vector<512x1xf32>
    %21 = math.rsqrt %20 : vector<512x1xf32>
    %22 = vector.broadcast %21 : vector<512x1xf32> to vector<512x16xf32>
    %23 = arith.mulf %13, %22 : vector<512x16xf32>
    %24 = vector.broadcast %6 : vector<1x16xf32> to vector<512x16xf32>
    %25 = arith.mulf %23, %24 : vector<512x16xf32>
    %26 = vector.broadcast %7 : vector<1x16xf32> to vector<512x16xf32>
    %27 = arith.addf %25, %26 : vector<512x16xf32>
    %28 = arith.truncf %27 : vector<512x16xf32> to vector<512x16xbf16>
    %c0_14 = arith.constant 0 : index
    %c0_15 = arith.constant 0 : index
    %29 = vector.load %arg6[%c0_14, %c0_15] : memref<512x16xbf16, #tpu.memory_space<vmem>>, vector<512x16xbf16>
    tpu.vector_store %arg6[%c0_14, %c0_15], %28 {strides = array<i32>} : memref<512x16xbf16, #tpu.memory_space<vmem>>, vector<512x16xbf16>,
    return
  }
  func.func @transform_0(%arg0: i32) -> (i32, i32) {
    %c0_i32 = arith.constant 0 : i32
    %c0_i32_0 = arith.constant 0 : i32
    return %arg0, %c0_i32 : i32, i32
  }
  func.func @transform_1(%arg0: i32) -> (i32, i32) {
    %c0_i32 = arith.constant 0 : i32
    %c0_i32_0 = arith.constant 0 : i32
    %c0_i32_1 = arith.constant 0 : i32
    return %c0_i32, %c0_i32_0 : i32, i32
  }
  func.func @transform_2(%arg0: i32) -> (i32, i32) {
    %c0_i32 = arith.constant 0 : i32
    %c0_i32_0 = arith.constant 0 : i32
    %c0_i32_1 = arith.constant 0 : i32
    return %c0_i32, %c0_i32_0 : i32, i32
  }
  func.func @transform_3(%arg0: i32) -> (i32, i32) {
    %c0_i32 = arith.constant 0 : i32
    %c0_i32_0 = arith.constant 0 : i32
    %c0_i32_1 = arith.constant 0 : i32
    return %c0_i32, %c0_i32_0 : i32, i32
  }
  func.func @transform_4(%arg0: i32) -> (i32, i32) {
    %c0_i32 = arith.constant 0 : i32
    %c0_i32_0 = arith.constant 0 : i32
    %c0_i32_1 = arith.constant 0 : i32
    return %c0_i32, %c0_i32_0 : i32, i32
  }
  func.func @transform_5(%arg0: i32) -> (i32, i32) {
    %c0_i32 = arith.constant 0 : i32
    %c0_i32_0 = arith.constant 0 : i32
    return %arg0, %c0_i32 : i32, i32
  }
}

</mosaic_0001>

<bundles_post_ra>
// kernel: tpu_custom_call.1
= control target key start
LH: loop header
LB: loop body
LE: loop exit
PB: predicated region body
PF: predicated region fallthrough
CT: control target
= control target key end

     0   :  { %10 = vsyncpa [#allocation3], 0  ;;  %s3822_s0 = inlined_call_operand.hbm [shape: bf16[512,48], index: 0, kind: input, shape index: {}]   ;;  %s3823_s1 = inlined_call_operand.hbm [shape: bf16[48,16], index: 1, kind: input, shape index: {}]   ;;  %s3824_s2 = inlined_call_operand.hbm [shape: f32[1,16], index: 2, kind: input, shape index: {}]   ;;  %s3825_s3 = inlined_call_operand.hbm [shape: f32[1,16], index: 3, kind: input, shape index: {}]   ;;  %s3826_s4 = inlined_call_operand.hbm [shape: f32[1,16], index: 4, kind: input, shape index: {}]   ;;  %s3827_s5 = inlined_call_operand.hbm [shape: bf16[512,16], index: 5, kind: output, shape index: {}]  }
   0x1   :  { %11 = vsyncpa [#allocation6], 0 }
   0x2   :  { %12 = vsyncpa [#allocation9], 0 }
   0x3   :  { %13 = vsyncpa [#allocation4], 0  ;;  %s2663_s18 = smov [#allocation5]   ;;  %s2664_s20 = smov [#allocation8]  }
   0x4   :  { %s31_s19 = sshll.u32 %s2663_s18, 4  ;;  %s54_s21 = sshll.u32 %s2664_s20, 4  ;;  %s32_s19 = int_to_ptr.vmem [resolvable:$true] %s31_s19  ;;  %s2701_s21 = int_to_ptr.vmem [resolvable:$true] %s54_s21 }
   0x5   :  { %s2523_s24 = scalar_lea.hbm %s3823_s1, 384 }
   0x6   :  { %p2524_p0 = scmp.ne.s32.totalorder %s3823_s1, %s2523_s24  ;;  %p2527_p1 = scmp.lt.u32.totalorder %s2523_s24, %s3823_s1 }
   0x8   :  { %p2529_p2 = pnand %p2527_p1, %p2524_p0 }
   0xa   :  { %2532 = shalt.err (!%p2529_p2)
}
   0xb   :  { %s2533_s29 = scalar_lea.vmem %s32_s19, 384  ;;  %p2538_p4 = scmp.lt.s32.totalorder %s32_s19, %s32_s19 }
   0xc   :  { %p2534_p3 = scmp.ne.s32.totalorder %s32_s19, %s2533_s29  ;;  %p2539_p5 = scmp.lt.s32.totalorder %s2533_s29, %s2533_s29 }
   0xe   :  { %p2540_p6 = por %p2539_p5, %p2538_p4 }
  0x10   :  { %p2541_p7 = pnand %p2540_p6, %p2534_p3 }
  0x12   :  { %2544 = shalt.err (!%p2541_p7)
}
  0x13   :  { %s2665_s30 = smov 64   ;;  %s2666_s6 = smov 4  }
  0x14   :  { %37 = dma.hbm_to_vmem [thread:$0]  %s3823_s1, 384, %s32_s19, [#allocation6], %s2665_s30, %s2665_s30, %s2666_s6  }
  0x15   :  { %s2545_s11 = scalar_lea.hbm %s3825_s3, 16 }
  0x16   :  { %p2546_p8 = scmp.ne.s32.totalorder %s3825_s3, %s2545_s11  ;;  %p2549_p9 = scmp.lt.u32.totalorder %s2545_s11, %s3825_s3 }
  0x18   :  { %p2551_p10 = pnand %p2549_p9, %p2546_p8 }
  0x1a   :  { %2554 = shalt.err (!%p2551_p10)
}
  0x1b   :  { %s2555_s16 = scalar_lea.vmem %s2701_s21, 16  ;;  %s2559_s1 = scalar_lea.vmem %s2701_s21, 32 }
  0x1c   :  { %p2556_p11 = scmp.ne.s32.totalorder %s2701_s21, %s2555_s16  ;;  %p2560_p12 = scmp.lt.s32.totalorder %s2701_s21, %s2701_s21 }
  0x1d   :  { %p2561_p13 = scmp.lt.s32.totalorder %s2559_s1, %s2555_s16 }
  0x1f   :  { %p2562_p0 = por %p2561_p13, %p2560_p12 }
  0x21   :  { %p2563_p1 = pnand %p2562_p0, %p2556_p11 }
  0x23   :  { %2566 = shalt.err (!%p2563_p1)
}
  0x24   :  { %57 = dma.hbm_to_vmem [thread:$0]  %s3825_s3, 16, %s2701_s21, [#allocation9]  }
  0x25   :  { %s2667_s19 = smov [#allocation2]   ;;  %s2668_s22 = smov [#allocation7]  }
  0x26   :  { %s19_s20 = sshll.u32 %s2667_s19, 4  ;;  %s44_s23 = sshll.u32 %s2668_s22, 4  ;;  %s20_s20 = int_to_ptr.vmem [resolvable:$true] %s19_s20  ;;  %s45_s23 = int_to_ptr.vmem [resolvable:$true] %s44_s23 }
  0x27   :  { %s2567_s26 = scalar_lea.hbm %s3822_s0, 4096 }
  0x28   :  { %p2568_p2 = scmp.ne.s32.totalorder %s3822_s0, %s2567_s26  ;;  %p2571_p3 = scmp.lt.u32.totalorder %s2567_s26, %s3822_s0 }
  0x2a   :  { %p2573_p4 = pnand %p2571_p3, %p2568_p2 }
  0x2c   :  { %2576 = shalt.err (!%p2573_p4)
}
  0x2d   :  { %s2577_s3 = scalar_lea.vmem %s20_s20, 4096  ;;  %p2582_p6 = scmp.lt.s32.totalorder %s20_s20, %s20_s20 }
  0x2e   :  { %p2578_p5 = scmp.ne.s32.totalorder %s20_s20, %s2577_s3  ;;  %p2583_p7 = scmp.lt.s32.totalorder %s2577_s3, %s2577_s3 }
  0x30   :  { %p2584_p8 = por %p2583_p7, %p2582_p6 }
  0x32   :  { %p2585_p9 = pnand %p2584_p8, %p2578_p5 }
  0x34   :  { %2588 = shalt.err (!%p2585_p9)
}
  0x35   :  { %25 = dma.hbm_to_vmem [thread:$0]  %s3822_s0, 4096, %s20_s20, [#allocation3], %s2665_s30, %s2665_s30, %s2666_s6  }
  0x36   :  { %s2589_s11 = scalar_lea.hbm %s3824_s2, 16 }
  0x37   :  { %p2590_p10 = scmp.ne.s32.totalorder %s3824_s2, %s2589_s11  ;;  %p2593_p11 = scmp.lt.u32.totalorder %s2589_s11, %s3824_s2 }
  0x39   :  { %p2595_p12 = pnand %p2593_p11, %p2590_p10 }
  0x3b   :  { %2598 = shalt.err (!%p2595_p12)
}
  0x3c   :  { %s2599_s16 = scalar_lea.vmem %s45_s23, 16  ;;  %s2603_s1 = scalar_lea.vmem %s45_s23, 32 }
  0x3d   :  { %p2600_p13 = scmp.ne.s32.totalorder %s45_s23, %s2599_s16  ;;  %p2604_p0 = scmp.lt.s32.totalorder %s45_s23, %s45_s23 }
  0x3e   :  { %p2605_p1 = scmp.lt.s32.totalorder %s2603_s1, %s2599_s16 }
  0x40   :  { %p2606_p2 = por %p2605_p1, %p2604_p0 }
  0x42   :  { %p2607_p3 = pnand %p2606_p2, %p2600_p13 }
  0x44   :  { %2610 = shalt.err (!%p2607_p3)
}
  0x45   :  { %47 = dma.hbm_to_vmem [thread:$0]  %s3824_s2, 16, %s45_s23, [#allocation6]  }
  0x46   :  { %s2669_s18 = smov [#allocation10]   ;;  %s2611_s24 = scalar_lea.hbm %s3826_s4, 16 }
  0x47   :  { %s64_s19 = sshll.u32 %s2669_s18, 4  ;;  %p2612_p4 = scmp.ne.s32.totalorder %s3826_s4, %s2611_s24  ;;  %s65_s19 = int_to_ptr.vmem [resolvable:$true] %s64_s19 }
  0x48   :  { %p2615_p5 = scmp.lt.u32.totalorder %s2611_s24, %s3826_s4 }
  0x4a   :  { %p2617_p6 = pnand %p2615_p5, %p2612_p4 }
  0x4c   :  { %2620 = shalt.err (!%p2617_p6)
}
  0x4d   :  { %s2621_s29 = scalar_lea.vmem %s65_s19, 16  ;;  %s2625_s2 = scalar_lea.vmem %s65_s19, 32 }
  0x4e   :  { %p2622_p7 = scmp.ne.s32.totalorder %s65_s19, %s2621_s29  ;;  %p2626_p8 = scmp.lt.s32.totalorder %s65_s19, %s65_s19 }
  0x4f   :  { %p2627_p9 = scmp.lt.s32.totalorder %s2625_s2, %s2621_s29 }
  0x51   :  { %p2628_p10 = por %p2627_p9, %p2626_p8 }
  0x53   :  { %p2629_p11 = pnand %p2628_p10, %p2622_p7 }
  0x55   :  { %2632 = shalt.err (!%p2629_p11)
}
  0x56   :  { %67 = dma.hbm_to_vmem [thread:$0]  %s3826_s4, 16, %s65_s19, [#allocation9]  }
  0x57   :  { %2655 = dma.done.wait [#allocation3], 4096  }
  0x58   :  { %2656 = vsyncadd [#allocation3], 4294963200 }
  0x59   :  { %2657 = dma.done.wait [#allocation6], 400  }
  0x5a   :  { %2658 = vsyncadd [#allocation6], 4294966896 }
  0x5b   :  { %2659 = dma.done.wait [#allocation9], 32  }
  0x5c   :  { %2660 = vsyncadd [#allocation9], 4294967264  ;;  %v2358_v0 = vld [vmem:[#allocation5] sm:$0xff]   ;;  %v2359_v1 = vld [vmem:[#allocation5 + $0x8] sm:$0xff]   ;;  %vm339_vm0 = vcmask 392192   ;;  %vm727_vm1 = vcmask 130048  }
  0x5d   :  { %2274 = vmatprep.subr.bf16.mxu0 %v2358_v0  ;;  %2344 = vmatprep.subr.bf16.mxu1 %v2358_v0  ;;  %v2360_v2 = vld [vmem:[#allocation5 + $0x10] sm:$0xff]   ;;  %v2361_v3 = vld [vmem:[#allocation2] sm:$0xff]   ;;  %v2363_v5 = vld [vmem:[#allocation2 + $0x8] sm:$0xff]   ;;  %vm1957_vm2 = vcmask 125952   ;;  %s2670_s4 = smov [#allocation11]  }
  0x5e   :  { %2275 = vmatpush3.bf16.msra.mxu0 %v2358_v0  ;;  %2347 = vmatpush3.bf16.msra.mxu1 %v2358_v0  ;;  %v2362_v4 = vld [vmem:[#allocation2 + $0x80] sm:$0xff]   ;;  %v2364_v6 = vld [vmem:[#allocation2 + $0x88] sm:$0xff]   ;;  %v2365_v7 = vld [vmem:[#allocation2 + $0x10] sm:$0xff]   ;;  %s2027_s3 = sshll.u32 %s2670_s4, 4  ;;  %s2028_s3 = int_to_ptr.vmem [resolvable:$true] %s2027_s3 }
  0x5f   :  { %2276 = vmatprep.subr.bf16.mxu0 %v2359_v1  ;;  %2345 = vmatprep.subr.bf16.mxu1 %v2359_v1  ;;  %v2367_v8 = vld [vmem:[#allocation2 + $0x90] sm:$0xff]   ;;  %v2366_v9 = vld [vmem:[#allocation2 + $0x18] sm:$0xff]   ;;  %v2369_v11 = vld [vmem:[#allocation2 + $0x20] sm:$0xff]   ;;  %s2633_s21 = scalar_lea.vmem %s2028_s3, 4096  ;;  %p2638_p13 = scmp.lt.s32.totalorder %s2028_s3, %s2028_s3 }
  0x60   :  { %2280 = vmatprep.mubr.msk.bf16.mxu0 %vm339_vm0, %v2361_v3  ;;  %2312 = vmatprep.mubr.msk.bf16.mxu1 %vm339_vm0, %v2362_v4  ;;  %v2368_v10 = vld [vmem:[#allocation2 + $0x98] sm:$0xff]   ;;  %v2371_v12 = vld [vmem:[#allocation2 + $0xa0] sm:$0xff]   ;;  %v2370_v13 = vld [vmem:[#allocation2 + $0x28] sm:$0xff]   ;;  %p2634_p12 = scmp.ne.s32.totalorder %s2028_s3, %s2633_s21  ;;  %p2639_p0 = scmp.lt.s32.totalorder %s2633_s21, %s2633_s21 }
  0x61   :  { %v2372_v14 = vld [vmem:[#allocation2 + $0xa8] sm:$0xff]   ;;  %v2373_v15 = vld [vmem:[#allocation2 + $0x30] sm:$0xff]   ;;  %v2374_v17 = vld [vmem:[#allocation2 + $0x38] sm:$0xff]  }
  0x62   :  { %2277 = vmatpush3.bf16.msra.mxu0 %v2359_v1  ;;  %2348 = vmatpush3.bf16.msra.mxu1 %v2359_v1  ;;  %v2375_v16 = vld [vmem:[#allocation2 + $0xb0] sm:$0xff]   ;;  %v2376_v18 = vld [vmem:[#allocation2 + $0xb8] sm:$0xff]   ;;  %v2377_v19 = vld [vmem:[#allocation2 + $0x40] sm:$0xff]   ;;  %p2640_p1 = por %p2639_p0, %p2638_p13 }
  0x63   :  { %2278 = vmatprep.subr.bf16.mxu0 %v2360_v2  ;;  %2346 = vmatprep.subr.bf16.mxu1 %v2360_v2  ;;  %v2379_v20 = vld [vmem:[#allocation2 + $0xc0] sm:$0xff]   ;;  %v2378_v21 = vld [vmem:[#allocation2 + $0x48] sm:$0xff]   ;;  %v2381_v23 = vld [vmem:[#allocation2 + $0x50] sm:$0xff]  }
  0x64   :  { %v2380_v22 = vld [vmem:[#allocation2 + $0xc8] sm:$0xff]   ;;  %v2383_v24 = vld [vmem:[#allocation2 + $0xd0] sm:$0xff]   ;;  %v2382_v25 = vld [vmem:[#allocation2 + $0x58] sm:$0xff]   ;;  %p2641_p2 = pnand %p2640_p1, %p2634_p12 }
  0x65   :  { %v2384_v26 = vld [vmem:[#allocation2 + $0xd8] sm:$0xff]   ;;  %v2385_v27 = vld [vmem:[#allocation2 + $0x60] sm:$0xff]   ;;  %v2386_v29 = vld [vmem:[#allocation2 + $0x68] sm:$0xff]  }
  0x66   :  { %2279 = vmatpush3.bf16.msra.mxu0 %v2360_v2  ;;  %2349 = vmatpush3.bf16.msra.mxu1 %v2360_v2  ;;  %v2387_v28 = vld [vmem:[#allocation2 + $0xe0] sm:$0xff]   ;;  %v2388_v30 = vld [vmem:[#allocation2 + $0xe8] sm:$0xff]   ;;  %v2389_v31 = vld [vmem:[#allocation2 + $0x70] sm:$0xff]  }
  0x67   :  { %v2391_v32 = vld [vmem:[#allocation2 + $0xf0] sm:$0xff]   ;;  %v2390_v33 = vld [vmem:[#allocation2 + $0x78] sm:$0xff]  }
  0x68   :  { %v2392_v34 = vld [vmem:[#allocation2 + $0xf8] sm:$0xff]  }
  0x69   :  { %2281 = vmatmul.mubr.msk.bf16.vlgmr.msra.gmra.mrb[0].mxu0 %vm339_vm0, %v2363_v5  ;;  %2313 = vmatmul.mubr.msk.bf16.vlgmr.msra.gmra.mrb[0].mxu1 %vm339_vm0, %v2364_v6  ;;  %v2807_v35 = vld [vmem:[#allocation7] ss:$0 sm:$0xff] }
  0x6a   :  { %2284 = vmatprep.mubr.msk.bf16.mxu0 %vm339_vm0, %v2365_v7  ;;  %2316 = vmatprep.mubr.msk.bf16.mxu1 %vm339_vm0, %v2367_v8 }
  0x71   :  { %2285 = vmatmul.mubr.msk.bf16.gmra.mrb[4].mxu0 %vm339_vm0, %v2366_v9  ;;  %2317 = vmatmul.mubr.msk.bf16.gmra.mrb[4].mxu1 %vm339_vm0, %v2368_v10 }
  0x72   :  { %2288 = vmatprep.mubr.msk.bf16.mxu0 %vm339_vm0, %v2369_v11  ;;  %2320 = vmatprep.mubr.msk.bf16.mxu1 %vm339_vm0, %v2371_v12 }
  0x79   :  { %2289 = vmatmul.mubr.msk.bf16.gmra.mrb[8].mxu0 %vm339_vm0, %v2370_v13  ;;  %2321 = vmatmul.mubr.msk.bf16.gmra.mrb[8].mxu1 %vm339_vm0, %v2372_v14 }
  0x7a   :  { %2292 = vmatprep.mubr.msk.bf16.mxu0 %vm339_vm0, %v2373_v15  ;;  %2324 = vmatprep.mubr.msk.bf16.mxu1 %vm339_vm0, %v2375_v16 }
  0x81   :  { %2293 = vmatmul.mubr.msk.bf16.gmra.mrb[12].mxu0 %vm339_vm0, %v2374_v17  ;;  %2325 = vmatmul.mubr.msk.bf16.gmra.mrb[12].mxu1 %vm339_vm0, %v2376_v18 }
  0x82   :  { %2296 = vmatprep.mubr.msk.bf16.mxu0 %vm339_vm0, %v2377_v19  ;;  %2328 = vmatprep.mubr.msk.bf16.mxu1 %vm339_vm0, %v2379_v20 }
  0x89   :  { %2297 = vmatmul.mubr.msk.bf16.gmra.mrb[16].mxu0 %vm339_vm0, %v2378_v21  ;;  %2329 = vmatmul.mubr.msk.bf16.gmra.mrb[16].mxu1 %vm339_vm0, %v2380_v22 }
  0x8a   :  { %2300 = vmatprep.mubr.msk.bf16.mxu0 %vm339_vm0, %v2381_v23  ;;  %2332 = vmatprep.mubr.msk.bf16.mxu1 %vm339_vm0, %v2383_v24 }
  0x91   :  { %2301 = vmatmul.mubr.msk.bf16.gmra.mrb[20].mxu0 %vm339_vm0, %v2382_v25  ;;  %2333 = vmatmul.mubr.msk.bf16.gmra.mrb[20].mxu1 %vm339_vm0, %v2384_v26 }
  0x92   :  { %2304 = vmatprep.mubr.msk.bf16.mxu0 %vm339_vm0, %v2385_v27  ;;  %2336 = vmatprep.mubr.msk.bf16.mxu1 %vm339_vm0, %v2387_v28 }
  0x99   :  { %2305 = vmatmul.mubr.msk.bf16.gmra.mrb[24].mxu0 %vm339_vm0, %v2386_v29  ;;  %2337 = vmatmul.mubr.msk.bf16.gmra.mrb[24].mxu1 %vm339_vm0, %v2388_v30 }
  0x9a   :  { %2308 = vmatprep.mubr.msk.bf16.mxu0 %vm339_vm0, %v2389_v31  ;;  %2340 = vmatprep.mubr.msk.bf16.mxu1 %vm339_vm0, %v2391_v32 }
  0xa1   :  { %2309 = vmatmul.mubr.msk.bf16.gmra.mrb[28].mxu0 %vm339_vm0, %v2390_v33  ;;  %2341 = vmatmul.mubr.msk.bf16.gmra.mrb[28].mxu1 %vm339_vm0, %v2392_v34 }
 0x13c   :  { %v2282_v36 = vpop.f32.mrb[0].mxu0  ;;  %v2314_v37 = vpop.f32.mrb[0].mxu1 }
 0x13d   :  { %v2810_v38 = vadd.f32 %v2282_v36, %v2807_v35  ;;  %v2813_v39 = vadd.f32 %v2314_v37, %v2807_v35  ;;  %v470_v40 = vpop.f32.mrb[1].mxu0  ;;  %v598_v41 = vpop.f32.mrb[1].mxu1 }
 0x13e   :  { %v2283_v42 = vpop.f32.mrb[2].mxu0  ;;  %v2315_v43 = vpop.f32.mrb[2].mxu1  ;;  %v2816_v44 = vadd.f32 %v2807_v35, %v470_v40  ;;  %v2826_v50 = vadd.f32 %v2807_v35, %v598_v41 }
 0x13f   :  { %v2819_v45 = vadd.f32 %v2283_v42, %v2807_v35  ;;  %v473_v46 = vpop.f32.mrb[3].mxu0  ;;  %v601_v47 = vpop.f32.mrb[3].mxu1  ;;  %v830_v48 = vsel %vm727_vm1, %v2813_v39, 0.0  ;;  %v734_v49 = vsel %vm727_vm1, %v2810_v38, 0.0  ;;  %v2829_v51 = vadd.f32 %v2315_v43, %v2807_v35 }
 0x140   :  { %831 = vadd.xlane.f32.xlu0 %v830_v48  ;;  %735 = vadd.xlane.f32.xlu1 %v734_v49  ;;  %v728_v53 = vsel %vm727_vm1, %v2816_v44, 0.0  ;;  %v2836_v60 = vadd.f32 %v2807_v35, %v473_v46  ;;  %v2839_v61 = vadd.f32 %v2807_v35, %v601_v47  ;;  %v824_v63 = vsel %vm727_vm1, %v2826_v50, 0.0 }
 0x141   :  { %v737_v52 = vsel %vm727_vm1, %v2819_v45, 0.0  ;;  %v833_v62 = vsel %vm727_vm1, %v2829_v51, 0.0 }
 0x142   :  { %v827_v4 = vsel %vm727_vm1, %v2839_v61, 0.0  ;;  %v731_v5 = vsel %vm727_vm1, %v2836_v60, 0.0 }
 0x144   :  { %738 = vadd.xlane.f32.xlu1 %v737_v52  ;;  %729 = vadd.xlane.f32.xlu0 %v728_v53  ;;  %v2286_v54 = vpop.f32.mrb[4].mxu0  ;;  %v2318_v55 = vpop.f32.mrb[4].mxu1 }
 0x145   :  { %v486_v56 = vpop.f32.mrb[5].mxu0  ;;  %v614_v57 = vpop.f32.mrb[5].mxu1  ;;  %v2846_v2 = vadd.f32 %v2286_v54, %v2807_v35  ;;  %v2858_v12 = vadd.f32 %v2318_v55, %v2807_v35 }
 0x146   :  { %v2287_v58 = vpop.f32.mrb[6].mxu0  ;;  %v2319_v59 = vpop.f32.mrb[6].mxu1  ;;  %v2870_v18 = vadd.f32 %v2807_v35, %v486_v56  ;;  %v2892_v28 = vadd.f32 %v2807_v35, %v614_v57 }
 0x147   :  { %v489_v0 = vpop.f32.mrb[7].mxu0  ;;  %v617_v1 = vpop.f32.mrb[7].mxu1  ;;  %v2849_v3 = vadd.f32 %v2287_v58, %v2807_v35  ;;  %v2861_v13 = vadd.f32 %v2319_v59, %v2807_v35  ;;  %v746_v15 = vsel %vm727_vm1, %v2846_v2, 0.0  ;;  %v842_v21 = vsel %vm727_vm1, %v2858_v12, 0.0 }
 0x148   :  { %834 = vadd.xlane.f32.xlu1 %v833_v62  ;;  %825 = vadd.xlane.f32.xlu0 %v824_v63  ;;  %v2873_v19 = vadd.f32 %v2807_v35, %v489_v0  ;;  %v2895_v29 = vadd.f32 %v2807_v35, %v617_v1  ;;  %v740_v31 = vsel %vm727_vm1, %v2870_v18, 0.0  ;;  %v836_v40 = vsel %vm727_vm1, %v2892_v28, 0.0 }
 0x149   :  { %v749_v14 = vsel %vm727_vm1, %v2849_v3, 0.0  ;;  %v845_v20 = vsel %vm727_vm1, %v2861_v13, 0.0 }
 0x14a   :  { %v743_v30 = vsel %vm727_vm1, %v2873_v19, 0.0  ;;  %v839_v37 = vsel %vm727_vm1, %v2895_v29, 0.0 }
 0x14c   :  { %828 = vadd.xlane.f32.xlu1 %v827_v4  ;;  %732 = vadd.xlane.f32.xlu0 %v731_v5  ;;  %v2290_v6 = vpop.f32.mrb[8].mxu0  ;;  %v2322_v7 = vpop.f32.mrb[8].mxu1 }
 0x14d   :  { %v502_v8 = vpop.f32.mrb[9].mxu0  ;;  %v2855_v9 = vpop.f32.mrb[9].mxu1  ;;  %v2906_v34 = vadd.f32 %v2290_v6, %v2807_v35  ;;  %v2922_v49 = vadd.f32 %v2322_v7, %v2807_v35 }
 0x14e   :  { %v2291_v10 = vpop.f32.mrb[10].mxu0  ;;  %v2323_v11 = vpop.f32.mrb[10].mxu1  ;;  %v2950_v5 = vadd.f32 %v2807_v35, %v502_v8 }
 0x14f   :  { %v505_v16 = vpop.f32.mrb[11].mxu0  ;;  %v2867_v17 = vpop.f32.mrb[11].mxu1  ;;  %v2909_v36 = vadd.f32 %v2291_v10, %v2807_v35  ;;  %v2925_v52 = vadd.f32 %v2323_v11, %v2807_v35  ;;  %v758_v58 = vsel %vm727_vm1, %v2906_v34, 0.0  ;;  %v854_v10 = vsel %vm727_vm1, %v2922_v49, 0.0 }
 0x150   :  { %750 = vadd.xlane.f32.xlu1 %v749_v14  ;;  %747 = vadd.xlane.f32.xlu0 %v746_v15  ;;  %3862 = vst [vmem:[#allocation16_spill] sm:$0xff] %v2950_v5  ;;  %v2953_v6 = vadd.f32 %v2807_v35, %v505_v16  ;;  %v2967_v16 = vadd.f32 %v2807_v35, %v2855_v9 }
 0x151   :  { %v761_v57 = vsel %vm727_vm1, %v2909_v36, 0.0  ;;  %v857_v7 = vsel %vm727_vm1, %v2925_v52, 0.0 }
 0x152   :  { %3863 = vst [vmem:[#allocation17_spill] sm:$0xff] %v2967_v16 }
 0x154   :  { %846 = vadd.xlane.f32.xlu1 %v845_v20  ;;  %843 = vadd.xlane.f32.xlu0 %v842_v21  ;;  %v2879_v22 = vpop.f32.mrb[12].mxu0  ;;  %v2881_v23 = vpop.f32.mrb[12].mxu1 }
 0x155   :  { %v2883_v24 = vpop.f32.mrb[13].mxu0  ;;  %v2885_v25 = vpop.f32.mrb[13].mxu1 }
 0x156   :  { %v2887_v26 = vpop.f32.mrb[14].mxu0  ;;  %v2889_v27 = vpop.f32.mrb[14].mxu1 }
 0x157   :  { %v2901_v32 = vpop.f32.mrb[15].mxu0  ;;  %v2903_v33 = vpop.f32.mrb[15].mxu1 }
 0x158   :  { %744 = vadd.xlane.f32.xlu1 %v743_v30  ;;  %741 = vadd.xlane.f32.xlu0 %v740_v31  ;;  %v2971_v30 = vadd.f32 %v2807_v35, %v2867_v17 }
 0x15a   :  { %3864 = vst [vmem:[#allocation18_spill] sm:$0xff] %v2971_v30 }
 0x15c   :  { %840 = vadd.xlane.f32.xlu1 %v839_v37  ;;  %837 = vadd.xlane.f32.xlu0 %v836_v40  ;;  %v2298_v41 = vpop.f32.mrb[16].mxu0  ;;  %v2330_v42 = vpop.f32.mrb[16].mxu1 }
 0x15d   :  { %v2916_v43 = vadd.f32 %v2298_v41, %v2807_v35  ;;  %v534_v46 = vpop.f32.mrb[17].mxu0  ;;  %v2919_v47 = vadd.f32 %v2330_v42, %v2807_v35  ;;  %v662_v48 = vpop.f32.mrb[17].mxu1  ;;  %v755_v42 = vsel %vm727_vm1, %v2953_v6, 0.0 }
 0x15e   :  { %v2928_v53 = vadd.f32 %v2807_v35, %v534_v46  ;;  %v2299_v54 = vpop.f32.mrb[18].mxu0  ;;  %v2931_v55 = vadd.f32 %v2807_v35, %v662_v48  ;;  %v2331_v56 = vpop.f32.mrb[18].mxu1  ;;  %v752_v46 = vsel %vm727_vm1, %v2950_v5, 0.0 }
 0x15f   :  { %v2938_v59 = vadd.f32 %v2299_v54, %v2807_v35  ;;  %v537_v62 = vpop.f32.mrb[19].mxu0  ;;  %v2941_v63 = vadd.f32 %v2331_v56, %v2807_v35  ;;  %v665_v0 = vpop.f32.mrb[19].mxu1 }
 0x160   :  { %762 = vadd.xlane.f32.xlu1 %v761_v57  ;;  %759 = vadd.xlane.f32.xlu0 %v758_v58  ;;  %v2944_v1 = vadd.f32 %v2807_v35, %v537_v62  ;;  %v2947_v4 = vadd.f32 %v2807_v35, %v665_v0  ;;  %v2997_v58 = vadd.f32 %v2879_v22, %v2807_v35  ;;  %v851_v0 = vsel %vm727_vm1, %v2971_v30, 0.0 }
 0x161   :  { %v3001_v62 = vadd.f32 %v2887_v26, %v2807_v35  ;;  %v3015_v26 = vadd.f32 %v2881_v23, %v2807_v35 }
 0x162   :  { %3865 = vst [vmem:[#allocation19_spill] sm:$0xff] %v2997_v58 }
 0x163   :  { %3866 = vst [vmem:[#allocation20_spill] sm:$0xff] %v3001_v62  ;;  %3867 = vst [vmem:[#allocation21_spill] sm:$0xff] %v3015_v26 }
 0x164   :  { %858 = vadd.xlane.f32.xlu1 %v857_v7  ;;  %855 = vadd.xlane.f32.xlu0 %v854_v10  ;;  %v2302_v11 = vpop.f32.mrb[20].mxu0  ;;  %v2334_v14 = vpop.f32.mrb[20].mxu1  ;;  %v848_v7 = vsel %vm727_vm1, %v2967_v16, 0.0 }
 0x165   :  { %v2960_v15 = vadd.f32 %v2302_v11, %v2807_v35  ;;  %v550_v20 = vpop.f32.mrb[21].mxu0  ;;  %v2963_v8 = vadd.f32 %v2334_v14, %v2807_v35  ;;  %v678_v21 = vpop.f32.mrb[21].mxu1 }
 0x166   :  { %v2974_v31 = vadd.f32 %v2807_v35, %v550_v20  ;;  %v2303_v37 = vpop.f32.mrb[22].mxu0  ;;  %v2977_v40 = vadd.f32 %v2807_v35, %v678_v21  ;;  %v2335_v41 = vpop.f32.mrb[22].mxu1 }
 0x167   :  { %v2984_v9 = vadd.f32 %v2303_v37, %v2807_v35  ;;  %v553_v48 = vpop.f32.mrb[23].mxu0  ;;  %v2987_v17 = vadd.f32 %v2335_v41, %v2807_v35  ;;  %v681_v54 = vpop.f32.mrb[23].mxu1  ;;  %v3019_v37 = vadd.f32 %v2889_v27, %v2807_v35 }
 0x168   :  { %756 = vadd.xlane.f32.xlu1 %v755_v42  ;;  %753 = vadd.xlane.f32.xlu0 %v752_v46  ;;  %v2990_v56 = vadd.f32 %v2807_v35, %v553_v48  ;;  %v2993_v57 = vadd.f32 %v2807_v35, %v681_v54  ;;  %v773_v54 = vsel %vm727_vm1, %v3001_v62, 0.0 }
 0x169   :  { %3868 = vst [vmem:[#allocation22_spill] sm:$0xff] %v3019_v37 }
 0x16c   :  { %852 = vadd.xlane.f32.xlu1 %v851_v0  ;;  %849 = vadd.xlane.f32.xlu0 %v848_v7  ;;  %v2306_v10 = vpop.f32.mrb[24].mxu0  ;;  %v2338_v11 = vpop.f32.mrb[24].mxu1  ;;  %v770_v0 = vsel %vm727_vm1, %v2997_v58, 0.0 }
 0x16d   :  { %v3008_v14 = vadd.f32 %v2306_v10, %v2807_v35  ;;  %v566_v20 = vpop.f32.mrb[25].mxu0  ;;  %v3011_v22 = vadd.f32 %v2338_v11, %v2807_v35  ;;  %v694_v21 = vpop.f32.mrb[25].mxu1 }
 0x16e   :  { %v3022_v41 = vadd.f32 %v2807_v35, %v566_v20  ;;  %v2307_v42 = vpop.f32.mrb[26].mxu0  ;;  %v3025_v46 = vadd.f32 %v2807_v35, %v694_v21  ;;  %v2339_v48 = vpop.f32.mrb[26].mxu1  ;;  %v3045_v21 = vadd.f32 %v2807_v35, %v2883_v24 }
 0x16f   :  { %v3032_v23 = vadd.f32 %v2307_v42, %v2807_v35  ;;  %v569_v7 = vpop.f32.mrb[27].mxu0  ;;  %v3035_v27 = vadd.f32 %v2339_v48, %v2807_v35  ;;  %v697_v10 = vpop.f32.mrb[27].mxu1  ;;  %v3049_v42 = vadd.f32 %v2807_v35, %v2901_v32  ;;  %v869_v48 = vsel %vm727_vm1, %v3019_v37, 0.0 }
 0x170   :  { %774 = vadd.xlane.f32.xlu1 %v773_v54  ;;  %771 = vadd.xlane.f32.xlu0 %v770_v0  ;;  %v3038_v11 = vadd.f32 %v2807_v35, %v569_v7  ;;  %v3041_v20 = vadd.f32 %v2807_v35, %v697_v10  ;;  %v866_v54 = vsel %vm727_vm1, %v3015_v26, 0.0  ;;  %v3063_v32 = vadd.f32 %v2807_v35, %v2885_v25 }
 0x171   :  { %3869 = vst [vmem:[#allocation23_spill] sm:$0xff] %v3049_v42  ;;  %v3067_v37 = vadd.f32 %v2807_v35, %v2903_v33  ;;  %v764_v16 = vsel %vm727_vm1, %v3045_v21, 0.0 }
 0x174   :  { %870 = vadd.xlane.f32.xlu1 %v869_v48  ;;  %867 = vadd.xlane.f32.xlu0 %v866_v54  ;;  %v2310_v0 = vpop.f32.mrb[28].mxu0  ;;  %v2342_v7 = vpop.f32.mrb[28].mxu1 }
 0x175   :  { %v3056_v10 = vadd.f32 %v2310_v0, %v2807_v35  ;;  %v582_v58 = vpop.f32.mrb[29].mxu0  ;;  %v3059_v24 = vadd.f32 %v2342_v7, %v2807_v35  ;;  %v710_v62 = vpop.f32.mrb[29].mxu1  ;;  %v767_v7 = vsel %vm727_vm1, %v3049_v42, 0.0  ;;  %v863_v42 = vsel %vm727_vm1, %v3067_v37, 0.0 }
 0x176   :  { %v3070_v48 = vadd.f32 %v2807_v35, %v582_v58  ;;  %v2311_v54 = vpop.f32.mrb[30].mxu0  ;;  %v3073_v0 = vadd.f32 %v2807_v35, %v710_v62  ;;  %v2343_v26 = vpop.f32.mrb[30].mxu1 }
 0x177   :  { %3870 = vst [vmem:[#allocation24_spill] sm:$0xff] %v3059_v24  ;;  %v3080_v25 = vadd.f32 %v2311_v54, %v2807_v35  ;;  %v585_v30 = vpop.f32.mrb[31].mxu0  ;;  %v3083_v33 = vadd.f32 %v2343_v26, %v2807_v35  ;;  %v713_v58 = vpop.f32.mrb[31].mxu1  ;;  %v860_v54 = vsel %vm727_vm1, %v3063_v32, 0.0  ;;  %v785_v26 = vsel %vm727_vm1, %v2938_v59, 0.0 }
 0x178   :  { %3871 = vst [vmem:[#allocation25_spill] sm:$0xff] %v3070_v48  ;;  %768 = vadd.xlane.f32.xlu1 %v767_v7  ;;  %765 = vadd.xlane.f32.xlu0 %v764_v16  ;;  %v3086_v62 = vadd.f32 %v2807_v35, %v585_v30  ;;  %v3089_v5 = vadd.f32 %v2807_v35, %v713_v58  ;;  %v782_v16 = vsel %vm727_vm1, %v2916_v43, 0.0  ;;  %v881_v35 = vsel %vm727_vm1, %v2941_v63, 0.0 }
 0x179   :  { %3872 = vst [vmem:[#allocation26_spill] sm:$0xff] %v3083_v33  ;;  %v878_v30 = vsel %vm727_vm1, %v2919_v47, 0.0  ;;  %v776_v7 = vsel %vm727_vm1, %v2928_v53, 0.0  ;;  %v875_v58 = vsel %vm727_vm1, %v2947_v4, 0.0 }
 0x17a   :  { %3873 = vst [vmem:[#allocation27_spill] sm:$0xff] %v3086_v62  ;;  %3874 = vst [vmem:[#allocation28_spill] sm:$0xff] %v3089_v5 }
 0x17c   :  { %864 = vadd.xlane.f32.xlu1 %v863_v42  ;;  %861 = vadd.xlane.f32.xlu0 %v860_v54  ;;  %v779_v42 = vsel %vm727_vm1, %v2944_v1, 0.0  ;;  %v872_v54 = vsel %vm727_vm1, %v2931_v55, 0.0 }
 0x180   :  { %786 = vadd.xlane.f32.xlu1 %v785_v26  ;;  %783 = vadd.xlane.f32.xlu0 %v782_v16  ;;  %v797_v26 = vsel %vm727_vm1, %v2984_v9, 0.0  ;;  %v794_v16 = vsel %vm727_vm1, %v2960_v15, 0.0 }
 0x184   :  { %882 = vadd.xlane.f32.xlu1 %v881_v35  ;;  %879 = vadd.xlane.f32.xlu0 %v878_v30  ;;  %v893_v35 = vsel %vm727_vm1, %v2987_v17, 0.0  ;;  %v890_v30 = vsel %vm727_vm1, %v2963_v8, 0.0 }
 0x188   :  { %780 = vadd.xlane.f32.xlu1 %v779_v42  ;;  %777 = vadd.xlane.f32.xlu0 %v776_v7  ;;  %v791_v42 = vsel %vm727_vm1, %v2990_v56, 0.0  ;;  %v788_v7 = vsel %vm727_vm1, %v2974_v31, 0.0 }
 0x18c   :  { %876 = vadd.xlane.f32.xlu1 %v875_v58  ;;  %873 = vadd.xlane.f32.xlu0 %v872_v54  ;;  %v887_v58 = vsel %vm727_vm1, %v2993_v57, 0.0  ;;  %v884_v54 = vsel %vm727_vm1, %v2977_v40, 0.0 }
 0x190   :  { %798 = vadd.xlane.f32.xlu1 %v797_v26  ;;  %795 = vadd.xlane.f32.xlu0 %v794_v16  ;;  %v809_v26 = vsel %vm727_vm1, %v3032_v23, 0.0  ;;  %v806_v16 = vsel %vm727_vm1, %v3008_v14, 0.0 }
 0x194   :  { %894 = vadd.xlane.f32.xlu1 %v893_v35  ;;  %891 = vadd.xlane.f32.xlu0 %v890_v30  ;;  %v905_v35 = vsel %vm727_vm1, %v3035_v27, 0.0  ;;  %v902_v30 = vsel %vm727_vm1, %v3011_v22, 0.0 }
 0x198   :  { %792 = vadd.xlane.f32.xlu1 %v791_v42  ;;  %789 = vadd.xlane.f32.xlu0 %v788_v7  ;;  %v803_v42 = vsel %vm727_vm1, %v3038_v11, 0.0  ;;  %v800_v7 = vsel %vm727_vm1, %v3022_v41, 0.0 }
 0x19c   :  { %888 = vadd.xlane.f32.xlu1 %v887_v58  ;;  %885 = vadd.xlane.f32.xlu0 %v884_v54  ;;  %v899_v58 = vsel %vm727_vm1, %v3041_v20, 0.0  ;;  %v896_v54 = vsel %vm727_vm1, %v3025_v46, 0.0 }
 0x1a0   :  { %810 = vadd.xlane.f32.xlu1 %v809_v26  ;;  %807 = vadd.xlane.f32.xlu0 %v806_v16  ;;  %v821_v26 = vsel %vm727_vm1, %v3080_v25, 0.0  ;;  %v818_v16 = vsel %vm727_vm1, %v3056_v10, 0.0 }
 0x1a4   :  { %906 = vadd.xlane.f32.xlu1 %v905_v35  ;;  %903 = vadd.xlane.f32.xlu0 %v902_v30  ;;  %v917_v35 = vsel %vm727_vm1, %v3083_v33, 0.0  ;;  %v914_v30 = vsel %vm727_vm1, %v3059_v24, 0.0 }
 0x1a8   :  { %804 = vadd.xlane.f32.xlu1 %v803_v42  ;;  %801 = vadd.xlane.f32.xlu0 %v800_v7  ;;  %v815_v42 = vsel %vm727_vm1, %v3086_v62, 0.0  ;;  %v812_v7 = vsel %vm727_vm1, %v3070_v48, 0.0 }
 0x1ac   :  { %900 = vadd.xlane.f32.xlu1 %v899_v58  ;;  %897 = vadd.xlane.f32.xlu0 %v896_v54  ;;  %v911_v58 = vsel %vm727_vm1, %v3089_v5, 0.0  ;;  %v908_v54 = vsel %vm727_vm1, %v3073_v0, 0.0 }
 0x1b0   :  { %822 = vadd.xlane.f32.xlu1 %v821_v26  ;;  %819 = vadd.xlane.f32.xlu0 %v818_v16 }
 0x1b4   :  { %918 = vadd.xlane.f32.xlu1 %v917_v35  ;;  %915 = vadd.xlane.f32.xlu0 %v914_v30 }
 0x1b8   :  { %816 = vadd.xlane.f32.xlu1 %v815_v42  ;;  %813 = vadd.xlane.f32.xlu0 %v812_v7 }
 0x1bc   :  { %912 = vadd.xlane.f32.xlu1 %v911_v58  ;;  %909 = vadd.xlane.f32.xlu0 %v908_v54 }
 0x1cd   :  { %v832_v26 = vpop.xlane.xlu0 %831  ;;  %v736_v16 = vpop.xlane.xlu1 %735 }
 0x1ce   :  { %v955_v35 = vmul.f32 0.0625, %v832_v26  ;;  %v923_v30 = vmul.f32 0.0625, %v736_v16 }
 0x1d0   :  { %v3160_v24 = vsub.f32 %v2813_v39, %v955_v35  ;;  %v3163_v33 = vsub.f32 %v2810_v38, %v923_v30 }
 0x1d1   :  { %v739_v42 = vpop.xlane.xlu1 %738  ;;  %v730_v7 = vpop.xlane.xlu0 %729 }
 0x1d2   :  { %3875 = vst [vmem:[#allocation29_spill] sm:$0xff] %v3160_v24  ;;  %v924_v48 = vmul.f32 0.0625, %v739_v42  ;;  %v921_v62 = vmul.f32 0.0625, %v730_v7  ;;  %v1051_v5 = vmul.f32 %v3163_v33, %v3163_v33  ;;  %v1083_v58 = vmul.f32 %v3160_v24, %v3160_v24 }
 0x1d4   :  { %v3170_v54 = vsub.f32 %v2819_v45, %v924_v48  ;;  %v3173_v26 = vsub.f32 %v2816_v44, %v921_v62  ;;  %v1119_v39 = vsel %vm727_vm1, %v1051_v5, 0.0  ;;  %v1215_v7 = vsel %vm727_vm1, %v1083_v58, 0.0 }
 0x1d5   :  { %v835_v38 = vpop.xlane.xlu1 %834  ;;  %1120 = vadd.xlane.f32.xlu0 %v1119_v39  ;;  %v826_v16 = vpop.xlane.xlu0 %825 }
 0x1d6   :  { %v956_v35 = vmul.f32 0.0625, %v835_v38  ;;  %v953_v30 = vmul.f32 0.0625, %v826_v16  ;;  %v1052_v42 = vmul.f32 %v3170_v54, %v3170_v54  ;;  %v1049_v5 = vmul.f32 %v3173_v26, %v3173_v26 }
 0x1d8   :  { %v3180_v24 = vsub.f32 %v2829_v51, %v956_v35  ;;  %v3183_v45 = vsub.f32 %v2826_v50, %v953_v30  ;;  %v1122_v44 = vsel %vm727_vm1, %v1052_v42, 0.0  ;;  %v1113_v30 = vsel %vm727_vm1, %v1049_v5, 0.0 }
 0x1d9   :  { %v829_v48 = vpop.xlane.xlu1 %828  ;;  %1123 = vadd.xlane.f32.xlu1 %v1122_v44  ;;  %1216 = vadd.xlane.f32.xlu0 %v1215_v7  ;;  %v733_v62 = vpop.xlane.xlu0 %732 }
 0x1da   :  { %3876 = vst [vmem:[#allocation30_spill] sm:$0xff] %v3183_v45  ;;  %v954_v39 = vmul.f32 0.0625, %v829_v48  ;;  %v922_v38 = vmul.f32 0.0625, %v733_v62  ;;  %v1084_v58 = vmul.f32 %v3180_v24, %v3180_v24  ;;  %v1081_v51 = vmul.f32 %v3183_v45, %v3183_v45 }
 0x1dc   :  { %v3193_v50 = vsub.f32 %v2839_v61, %v954_v39  ;;  %v3196_v16 = vsub.f32 %v2836_v60, %v922_v38  ;;  %v1218_v35 = vsel %vm727_vm1, %v1084_v58, 0.0  ;;  %v1209_v45 = vsel %vm727_vm1, %v1081_v51, 0.0 }
 0x1dd   :  { %v751_v42 = vpop.xlane.xlu1 %750  ;;  %1219 = vadd.xlane.f32.xlu1 %v1218_v35  ;;  %1114 = vadd.xlane.f32.xlu0 %v1113_v30  ;;  %v748_v7 = vpop.xlane.xlu0 %747 }
 0x1de   :  { %v928_v44 = vmul.f32 0.0625, %v751_v42  ;;  %v927_v48 = vmul.f32 0.0625, %v748_v7  ;;  %v1050_v62 = vmul.f32 %v3196_v16, %v3196_v16  ;;  %v1082_v5 = vmul.f32 %v3193_v50, %v3193_v50 }
 0x1e0   :  { %v3204_v61 = vsub.f32 %v2849_v3, %v928_v44  ;;  %v3207_v60 = vsub.f32 %v2846_v2, %v927_v48  ;;  %v1116_v39 = vsel %vm727_vm1, %v1050_v62, 0.0  ;;  %v1212_v7 = vsel %vm727_vm1, %v1082_v5, 0.0 }
 0x1e1   :  { %v847_v38 = vpop.xlane.xlu1 %846  ;;  %1210 = vadd.xlane.f32.xlu0 %v1209_v45  ;;  %1117 = vadd.xlane.f32.xlu1 %v1116_v39  ;;  %v844_v58 = vpop.xlane.xlu0 %843 }
 0x1e2   :  { %v960_v35 = vmul.f32 0.0625, %v847_v38  ;;  %v959_v30 = vmul.f32 0.0625, %v844_v58  ;;  %v1055_v51 = vmul.f32 %v3207_v60, %v3207_v60  ;;  %v1056_v3 = vmul.f32 %v3204_v61, %v3204_v61 }
 0x1e4   :  { %v3217_v2 = vsub.f32 %v2861_v13, %v960_v35  ;;  %v3220_v42 = vsub.f32 %v2858_v12, %v959_v30  ;;  %v1131_v45 = vsel %vm727_vm1, %v1055_v51, 0.0  ;;  %v1134_v58 = vsel %vm727_vm1, %v1056_v3, 0.0 }
 0x1e5   :  { %v745_v44 = vpop.xlane.xlu1 %744  ;;  %1213 = vadd.xlane.f32.xlu1 %v1212_v7  ;;  %1132 = vadd.xlane.f32.xlu0 %v1131_v45  ;;  %v742_v48 = vpop.xlane.xlu0 %741 }
 0x1e6   :  { %v926_v62 = vmul.f32 0.0625, %v745_v44  ;;  %v925_v39 = vmul.f32 0.0625, %v742_v48  ;;  %v1087_v38 = vmul.f32 %v3220_v42, %v3220_v42  ;;  %v1088_v35 = vmul.f32 %v3217_v2, %v3217_v2 }
 0x1e8   :  { %v3228_v13 = vsub.f32 %v2873_v19, %v926_v62  ;;  %v3231_v12 = vsub.f32 %v2870_v18, %v925_v39  ;;  %v1227_v5 = vsel %vm727_vm1, %v1087_v38, 0.0  ;;  %v1230_v48 = vsel %vm727_vm1, %v1088_v35, 0.0 }
 0x1e9   :  { %v841_v30 = vpop.xlane.xlu1 %840  ;;  %1135 = vadd.xlane.f32.xlu1 %v1134_v58  ;;  %1228 = vadd.xlane.f32.xlu0 %v1227_v5  ;;  %v838_v51 = vpop.xlane.xlu0 %837 }
 0x1ea   :  { %v958_v7 = vmul.f32 0.0625, %v841_v30  ;;  %v957_v45 = vmul.f32 0.0625, %v838_v51  ;;  %v1053_v3 = vmul.f32 %v3231_v12, %v3231_v12  ;;  %v1054_v19 = vmul.f32 %v3228_v13, %v3228_v13 }
 0x1ec   :  { %v3241_v18 = vsub.f32 %v2895_v29, %v958_v7  ;;  %v3244_v44 = vsub.f32 %v2892_v28, %v957_v45  ;;  %v1125_v62 = vsel %vm727_vm1, %v1053_v3, 0.0  ;;  %v1128_v51 = vsel %vm727_vm1, %v1054_v19, 0.0 }
 0x1ed   :  { %v763_v39 = vpop.xlane.xlu1 %762  ;;  %1231 = vadd.xlane.f32.xlu1 %v1230_v48  ;;  %1126 = vadd.xlane.f32.xlu0 %v1125_v62  ;;  %v760_v38 = vpop.xlane.xlu0 %759 }
 0x1ee   :  { %v932_v58 = vmul.f32 0.0625, %v763_v39  ;;  %v931_v5 = vmul.f32 0.0625, %v760_v38  ;;  %v1085_v30 = vmul.f32 %v3244_v44, %v3244_v44  ;;  %v1086_v7 = vmul.f32 %v3241_v18, %v3241_v18 }
 0x1f0   :  { %v3252_v29 = vsub.f32 %v2909_v36, %v932_v58  ;;  %v3255_v28 = vsub.f32 %v2906_v34, %v931_v5  ;;  %v1221_v35 = vsel %vm727_vm1, %v1085_v30, 0.0  ;;  %v1224_v38 = vsel %vm727_vm1, %v1086_v7, 0.0 }
 0x1f1   :  { %v859_v45 = vpop.xlane.xlu1 %858  ;;  %1129 = vadd.xlane.f32.xlu1 %v1128_v51  ;;  %1222 = vadd.xlane.f32.xlu0 %v1221_v35  ;;  %v856_v3 = vpop.xlane.xlu0 %855 }
 0x1f2   :  { %v964_v48 = vmul.f32 0.0625, %v859_v45  ;;  %v963_v62 = vmul.f32 0.0625, %v856_v3  ;;  %v1059_v19 = vmul.f32 %v3255_v28, %v3255_v28  ;;  %v1060_v36 = vmul.f32 %v3252_v29, %v3252_v29 }
 0x1f4   :  { %v3265_v34 = vsub.f32 %v2925_v52, %v964_v48  ;;  %v3268_v39 = vsub.f32 %v2922_v49, %v963_v62  ;;  %v1143_v58 = vsel %vm727_vm1, %v1059_v19, 0.0  ;;  %v1146_v3 = vsel %vm727_vm1, %v1060_v36, 0.0  ;;  %v3879_v49 = vld [vmem:[#allocation16_spill] sm:$0xff] }
 0x1f5   :  { %v757_v5 = vpop.xlane.xlu1 %756  ;;  %1225 = vadd.xlane.f32.xlu1 %v1224_v38  ;;  %1144 = vadd.xlane.f32.xlu0 %v1143_v58  ;;  %v754_v30 = vpop.xlane.xlu0 %753 }
 0x1f6   :  { %3877 = vst [vmem:[#allocation31_spill] sm:$0xff] %v3265_v34  ;;  %v930_v51 = vmul.f32 0.0625, %v757_v5  ;;  %v929_v35 = vmul.f32 0.0625, %v754_v30  ;;  %v1091_v45 = vmul.f32 %v3268_v39, %v3268_v39  ;;  %v1092_v62 = vmul.f32 %v3265_v34, %v3265_v34  ;;  %v3881_v30 = vld [vmem:[#allocation18_spill] sm:$0xff] }
 0x1f8   :  { %v3276_v52 = vsub.f32 %v2953_v6, %v930_v51  ;;  %v3279_v48 = vsub.f32 %v3879_v49, %v929_v35  ;;  %v1239_v7 = vsel %vm727_vm1, %v1091_v45, 0.0  ;;  %v3883_v35 = vld [vmem:[#allocation17_spill] sm:$0xff]  ;;  %v1242_v49 = vsel %vm727_vm1, %v1092_v62, 0.0 }
 0x1f9   :  { %v853_v19 = vpop.xlane.xlu1 %852  ;;  %1147 = vadd.xlane.f32.xlu1 %v1146_v3  ;;  %1240 = vadd.xlane.f32.xlu0 %v1239_v7  ;;  %v850_v38 = vpop.xlane.xlu0 %849 }
 0x1fa   :  { %3878 = vst [vmem:[#allocation32_spill] sm:$0xff] %v3276_v52  ;;  %3880 = vst [vmem:[#allocation16_spill] sm:$0xff] %v3279_v48  ;;  %v962_v58 = vmul.f32 0.0625, %v853_v19  ;;  %v961_v5 = vmul.f32 0.0625, %v850_v38  ;;  %v1057_v36 = vmul.f32 %v3279_v48, %v3279_v48  ;;  %v1058_v6 = vmul.f32 %v3276_v52, %v3276_v52 }
 0x1fc   :  { %v3289_v51 = vsub.f32 %v3881_v30, %v962_v58  ;;  %v3292_v45 = vsub.f32 %v3883_v35, %v961_v5  ;;  %v1137_v3 = vsel %vm727_vm1, %v1057_v36, 0.0  ;;  %v1140_v52 = vsel %vm727_vm1, %v1058_v6, 0.0  ;;  %v3885_v58 = vld [vmem:[#allocation20_spill] sm:$0xff]  ;;  %v3887_v5 = vld [vmem:[#allocation19_spill] sm:$0xff] }
 0x1fd   :  { %v775_v7 = vpop.xlane.xlu1 %774  ;;  %1243 = vadd.xlane.f32.xlu1 %v1242_v49  ;;  %1138 = vadd.xlane.f32.xlu0 %v1137_v3  ;;  %v772_v19 = vpop.xlane.xlu0 %771 }
 0x1fe   :  { %3882 = vst [vmem:[#allocation18_spill] sm:$0xff] %v3289_v51  ;;  %3884 = vst [vmem:[#allocation17_spill] sm:$0xff] %v3292_v45  ;;  %v936_v38 = vmul.f32 0.0625, %v775_v7  ;;  %v935_v34 = vmul.f32 0.0625, %v772_v19  ;;  %v1089_v48 = vmul.f32 %v3292_v45, %v3292_v45  ;;  %v1090_v36 = vmul.f32 %v3289_v51, %v3289_v51 }
 0x200   :  { %v3300_v30 = vsub.f32 %v3885_v58, %v936_v38  ;;  %v3303_v35 = vsub.f32 %v3887_v5, %v935_v34  ;;  %v1233_v62 = vsel %vm727_vm1, %v1089_v48, 0.0  ;;  %v3889_v58 = vld [vmem:[#allocation22_spill] sm:$0xff]  ;;  %v3890_v5 = vld [vmem:[#allocation21_spill] sm:$0xff]  ;;  %v1236_v51 = vsel %vm727_vm1, %v1090_v36, 0.0 }
 0x201   :  { %v871_v49 = vpop.xlane.xlu1 %870  ;;  %1141 = vadd.xlane.f32.xlu1 %v1140_v52  ;;  %1234 = vadd.xlane.f32.xlu0 %v1233_v62  ;;  %v868_v3 = vpop.xlane.xlu0 %867 }
 0x202   :  { %3886 = vst [vmem:[#allocation20_spill] sm:$0xff] %v3300_v30  ;;  %3888 = vst [vmem:[#allocation19_spill] sm:$0xff] %v3303_v35  ;;  %v968_v7 = vmul.f32 0.0625, %v871_v49  ;;  %v967_v19 = vmul.f32 0.0625, %v868_v3  ;;  %v1063_v6 = vmul.f32 %v3303_v35, %v3303_v35  ;;  %v1064_v38 = vmul.f32 %v3300_v30, %v3300_v30 }
 0x204   :  { %v3313_v34 = vsub.f32 %v3889_v58, %v968_v7  ;;  %v3316_v48 = vsub.f32 %v3890_v5, %v967_v19  ;;  %v1155_v52 = vsel %vm727_vm1, %v1063_v6, 0.0  ;;  %v1158_v30 = vsel %vm727_vm1, %v1064_v38, 0.0  ;;  %v3891_v7 = vld [vmem:[#allocation23_spill] sm:$0xff] }
 0x205   :  { %v769_v62 = vpop.xlane.xlu1 %768  ;;  %1237 = vadd.xlane.f32.xlu1 %v1236_v51  ;;  %1156 = vadd.xlane.f32.xlu0 %v1155_v52  ;;  %v766_v49 = vpop.xlane.xlu0 %765 }
 0x206   :  { %v934_v3 = vmul.f32 0.0625, %v769_v62  ;;  %v933_v45 = vmul.f32 0.0625, %v766_v49  ;;  %v1095_v35 = vmul.f32 %v3316_v48, %v3316_v48  ;;  %v1096_v51 = vmul.f32 %v3313_v34, %v3313_v34 }
 0x208   :  { %v3324_v58 = vsub.f32 %v3891_v7, %v934_v3  ;;  %v3327_v19 = vsub.f32 %v3045_v21, %v933_v45  ;;  %v1251_v36 = vsel %vm727_vm1, %v1095_v35, 0.0  ;;  %v1254_v35 = vsel %vm727_vm1, %v1096_v51, 0.0 }
 0x209   :  { %v865_v6 = vpop.xlane.xlu1 %864  ;;  %1159 = vadd.xlane.f32.xlu1 %v1158_v30  ;;  %1252 = vadd.xlane.f32.xlu0 %v1251_v36  ;;  %v862_v5 = vpop.xlane.xlu0 %861 }
 0x20a   :  { %3892 = vst [vmem:[#allocation22_spill] sm:$0xff] %v3324_v58  ;;  %v966_v52 = vmul.f32 0.0625, %v865_v6  ;;  %v965_v62 = vmul.f32 0.0625, %v862_v5  ;;  %v1061_v38 = vmul.f32 %v3327_v19, %v3327_v19  ;;  %v1062_v49 = vmul.f32 %v3324_v58, %v3324_v58 }
 0x20c   :  { %v3337_v21 = vsub.f32 %v3067_v37, %v966_v52  ;;  %v3340_v45 = vsub.f32 %v3063_v32, %v965_v62  ;;  %v1149_v30 = vsel %vm727_vm1, %v1061_v38, 0.0  ;;  %v1152_v58 = vsel %vm727_vm1, %v1062_v49, 0.0 }
 0x20d   :  { %v787_v3 = vpop.xlane.xlu1 %786  ;;  %1255 = vadd.xlane.f32.xlu1 %v1254_v35  ;;  %1150 = vadd.xlane.f32.xlu0 %v1149_v30  ;;  %v784_v7 = vpop.xlane.xlu0 %783 }
 0x20e   :  { %v940_v36 = vmul.f32 0.0625, %v787_v3  ;;  %v939_v6 = vmul.f32 0.0625, %v784_v7  ;;  %v1093_v5 = vmul.f32 %v3340_v45, %v3340_v45  ;;  %v1094_v52 = vmul.f32 %v3337_v21, %v3337_v21 }
 0x210   :  { %v3348_v37 = vsub.f32 %v2938_v59, %v940_v36  ;;  %v3351_v32 = vsub.f32 %v2916_v43, %v939_v6  ;;  %v1245_v51 = vsel %vm727_vm1, %v1093_v5, 0.0  ;;  %v1248_v7 = vsel %vm727_vm1, %v1094_v52, 0.0 }
 0x211   :  { %v883_v62 = vpop.xlane.xlu1 %882  ;;  %1153 = vadd.xlane.f32.xlu1 %v1152_v58  ;;  %1246 = vadd.xlane.f32.xlu0 %v1245_v51  ;;  %v880_v38 = vpop.xlane.xlu0 %879 }
 0x212   :  { %v972_v35 = vmul.f32 0.0625, %v883_v62  ;;  %v971_v30 = vmul.f32 0.0625, %v880_v38  ;;  %v1067_v49 = vmul.f32 %v3351_v32, %v3351_v32  ;;  %v1068_v59 = vmul.f32 %v3348_v37, %v3348_v37 }
 0x214   :  { %v3361_v43 = vsub.f32 %v2941_v63, %v972_v35  ;;  %v3364_v3 = vsub.f32 %v2919_v47, %v971_v30  ;;  %v1167_v58 = vsel %vm727_vm1, %v1067_v49, 0.0  ;;  %v1170_v38 = vsel %vm727_vm1, %v1068_v59, 0.0 }
 0x215   :  { %v781_v36 = vpop.xlane.xlu1 %780  ;;  %1249 = vadd.xlane.f32.xlu1 %v1248_v7  ;;  %1168 = vadd.xlane.f32.xlu0 %v1167_v58  ;;  %v778_v6 = vpop.xlane.xlu0 %777 }
 0x216   :  { %v938_v5 = vmul.f32 0.0625, %v781_v36  ;;  %v937_v51 = vmul.f32 0.0625, %v778_v6  ;;  %v1099_v62 = vmul.f32 %v3364_v3, %v3364_v3  ;;  %v1100_v35 = vmul.f32 %v3361_v43, %v3361_v43 }
 0x218   :  { %v3372_v63 = vsub.f32 %v2944_v1, %v938_v5  ;;  %v3375_v47 = vsub.f32 %v2928_v53, %v937_v51  ;;  %v1263_v52 = vsel %vm727_vm1, %v1099_v62, 0.0  ;;  %v1266_v6 = vsel %vm727_vm1, %v1100_v35, 0.0 }
 0x219   :  { %v877_v30 = vpop.xlane.xlu1 %876  ;;  %1171 = vadd.xlane.f32.xlu1 %v1170_v38  ;;  %1264 = vadd.xlane.f32.xlu0 %v1263_v52  ;;  %v874_v49 = vpop.xlane.xlu0 %873 }
 0x21a   :  { %v970_v7 = vmul.f32 0.0625, %v877_v30  ;;  %v969_v58 = vmul.f32 0.0625, %v874_v49  ;;  %v1065_v59 = vmul.f32 %v3375_v47, %v3375_v47  ;;  %v1066_v1 = vmul.f32 %v3372_v63, %v3372_v63 }
 0x21c   :  { %v3385_v53 = vsub.f32 %v2947_v4, %v970_v7  ;;  %v3388_v36 = vsub.f32 %v2931_v55, %v969_v58  ;;  %v1161_v5 = vsel %vm727_vm1, %v1065_v59, 0.0  ;;  %v1164_v49 = vsel %vm727_vm1, %v1066_v1, 0.0 }
 0x21d   :  { %v799_v51 = vpop.xlane.xlu1 %798  ;;  %1267 = vadd.xlane.f32.xlu1 %v1266_v6  ;;  %1162 = vadd.xlane.f32.xlu0 %v1161_v5  ;;  %v796_v62 = vpop.xlane.xlu0 %795 }
 0x21e   :  { %v944_v38 = vmul.f32 0.0625, %v799_v51  ;;  %v943_v52 = vmul.f32 0.0625, %v796_v62  ;;  %v1097_v30 = vmul.f32 %v3388_v36, %v3388_v36  ;;  %v1098_v7 = vmul.f32 %v3385_v53, %v3385_v53 }
 0x220   :  { %v3396_v4 = vsub.f32 %v2984_v9, %v944_v38  ;;  %v3399_v55 = vsub.f32 %v2960_v15, %v943_v52  ;;  %v1257_v35 = vsel %vm727_vm1, %v1097_v30, 0.0  ;;  %v1260_v62 = vsel %vm727_vm1, %v1098_v7, 0.0 }
 0x221   :  { %v895_v58 = vpop.xlane.xlu1 %894  ;;  %1165 = vadd.xlane.f32.xlu1 %v1164_v49  ;;  %1258 = vadd.xlane.f32.xlu0 %v1257_v35  ;;  %v892_v59 = vpop.xlane.xlu0 %891 }
 0x222   :  { %v976_v6 = vmul.f32 0.0625, %v895_v58  ;;  %v975_v5 = vmul.f32 0.0625, %v892_v59  ;;  %v1071_v1 = vmul.f32 %v3399_v55, %v3399_v55  ;;  %v1072_v9 = vmul.f32 %v3396_v4, %v3396_v4 }
 0x224   :  { %v3409_v15 = vsub.f32 %v2987_v17, %v976_v6  ;;  %v3412_v51 = vsub.f32 %v2963_v8, %v975_v5  ;;  %v1179_v38 = vsel %vm727_vm1, %v1071_v1, 0.0  ;;  %v1182_v59 = vsel %vm727_vm1, %v1072_v9, 0.0 }
 0x225   :  { %v793_v52 = vpop.xlane.xlu1 %792  ;;  %1261 = vadd.xlane.f32.xlu1 %v1260_v62  ;;  %1180 = vadd.xlane.f32.xlu0 %v1179_v38  ;;  %v790_v30 = vpop.xlane.xlu0 %789 }
 0x226   :  { %v942_v49 = vmul.f32 0.0625, %v793_v52  ;;  %v941_v35 = vmul.f32 0.0625, %v790_v30  ;;  %v1103_v58 = vmul.f32 %v3412_v51, %v3412_v51  ;;  %v1104_v6 = vmul.f32 %v3409_v15, %v3409_v15 }
 0x228   :  { %v3420_v17 = vsub.f32 %v2990_v56, %v942_v49  ;;  %v3423_v8 = vsub.f32 %v2974_v31, %v941_v35  ;;  %v1275_v7 = vsel %vm727_vm1, %v1103_v58, 0.0  ;;  %v1278_v30 = vsel %vm727_vm1, %v1104_v6, 0.0 }
 0x229   :  { %v889_v5 = vpop.xlane.xlu1 %888  ;;  %1183 = vadd.xlane.f32.xlu1 %v1182_v59  ;;  %1276 = vadd.xlane.f32.xlu0 %v1275_v7  ;;  %v886_v1 = vpop.xlane.xlu0 %885 }
 0x22a   :  { %v974_v62 = vmul.f32 0.0625, %v889_v5  ;;  %v973_v38 = vmul.f32 0.0625, %v886_v1  ;;  %v1069_v9 = vmul.f32 %v3423_v8, %v3423_v8  ;;  %v1070_v56 = vmul.f32 %v3420_v17, %v3420_v17 }
 0x22c   :  { %v3433_v31 = vsub.f32 %v2993_v57, %v974_v62  ;;  %v3436_v52 = vsub.f32 %v2977_v40, %v973_v38  ;;  %v1173_v49 = vsel %vm727_vm1, %v1069_v9, 0.0  ;;  %v1176_v1 = vsel %vm727_vm1, %v1070_v56, 0.0 }
 0x22d   :  { %v811_v35 = vpop.xlane.xlu1 %810  ;;  %1279 = vadd.xlane.f32.xlu1 %v1278_v30  ;;  %1174 = vadd.xlane.f32.xlu0 %v1173_v49  ;;  %v808_v58 = vpop.xlane.xlu0 %807 }
 0x22e   :  { %v948_v59 = vmul.f32 0.0625, %v811_v35  ;;  %v947_v7 = vmul.f32 0.0625, %v808_v58  ;;  %v1101_v5 = vmul.f32 %v3436_v52, %v3436_v52  ;;  %v1102_v62 = vmul.f32 %v3433_v31, %v3433_v31 }
 0x230   :  { %v3444_v57 = vsub.f32 %v3032_v23, %v948_v59  ;;  %v3447_v40 = vsub.f32 %v3008_v14, %v947_v7  ;;  %v1269_v6 = vsel %vm727_vm1, %v1101_v5, 0.0  ;;  %v1272_v58 = vsel %vm727_vm1, %v1102_v62, 0.0 }
 0x231   :  { %v907_v38 = vpop.xlane.xlu1 %906  ;;  %1177 = vadd.xlane.f32.xlu1 %v1176_v1  ;;  %1270 = vadd.xlane.f32.xlu0 %v1269_v6  ;;  %v904_v9 = vpop.xlane.xlu0 %903 }
 0x232   :  { %v980_v30 = vmul.f32 0.0625, %v907_v38  ;;  %v979_v49 = vmul.f32 0.0625, %v904_v9  ;;  %v1075_v56 = vmul.f32 %v3447_v40, %v3447_v40  ;;  %v1076_v23 = vmul.f32 %v3444_v57, %v3444_v57 }
 0x234   :  { %v3457_v14 = vsub.f32 %v3035_v27, %v980_v30  ;;  %v3460_v35 = vsub.f32 %v3011_v22, %v979_v49  ;;  %v1191_v59 = vsel %vm727_vm1, %v1075_v56, 0.0  ;;  %v1194_v9 = vsel %vm727_vm1, %v1076_v23, 0.0 }
 0x235   :  { %v805_v7 = vpop.xlane.xlu1 %804  ;;  %1273 = vadd.xlane.f32.xlu1 %v1272_v58  ;;  %1192 = vadd.xlane.f32.xlu0 %v1191_v59  ;;  %v802_v5 = vpop.xlane.xlu0 %801 }
 0x236   :  { %v946_v1 = vmul.f32 0.0625, %v805_v7  ;;  %v945_v6 = vmul.f32 0.0625, %v802_v5  ;;  %v1107_v38 = vmul.f32 %v3460_v35, %v3460_v35  ;;  %v1108_v30 = vmul.f32 %v3457_v14, %v3457_v14 }
 0x238   :  { %v3468_v27 = vsub.f32 %v3038_v11, %v946_v1  ;;  %v3471_v22 = vsub.f32 %v3022_v41, %v945_v6  ;;  %v1287_v62 = vsel %vm727_vm1, %v1107_v38, 0.0  ;;  %v1290_v5 = vsel %vm727_vm1, %v1108_v30, 0.0 }
 0x239   :  { %v901_v49 = vpop.xlane.xlu1 %900  ;;  %1195 = vadd.xlane.f32.xlu1 %v1194_v9  ;;  %1288 = vadd.xlane.f32.xlu0 %v1287_v62  ;;  %v898_v56 = vpop.xlane.xlu0 %897 }
 0x23a   :  { %3893 = vst [vmem:[#allocation21_spill] sm:$0xff] %v3468_v27  ;;  %v978_v58 = vmul.f32 0.0625, %v901_v49  ;;  %v977_v59 = vmul.f32 0.0625, %v898_v56  ;;  %v1073_v23 = vmul.f32 %v3471_v22, %v3471_v22  ;;  %v1074_v11 = vmul.f32 %v3468_v27, %v3468_v27 }
 0x23c   :  { %v3481_v41 = vsub.f32 %v3041_v20, %v978_v58  ;;  %v3484_v7 = vsub.f32 %v3025_v46, %v977_v59  ;;  %v1185_v1 = vsel %vm727_vm1, %v1073_v23, 0.0  ;;  %v1188_v56 = vsel %vm727_vm1, %v1074_v11, 0.0 }
 0x23d   :  { %v823_v6 = vpop.xlane.xlu1 %822  ;;  %1291 = vadd.xlane.f32.xlu1 %v1290_v5  ;;  %1186 = vadd.xlane.f32.xlu0 %v1185_v1  ;;  %v820_v38 = vpop.xlane.xlu0 %819 }
 0x23e   :  { %3894 = vst [vmem:[#allocation23_spill] sm:$0xff] %v3481_v41  ;;  %3895 = vst [vmem:[#allocation33_spill] sm:$0xff] %v3484_v7  ;;  %v952_v9 = vmul.f32 0.0625, %v823_v6  ;;  %v951_v62 = vmul.f32 0.0625, %v820_v38  ;;  %v1105_v49 = vmul.f32 %v3484_v7, %v3484_v7  ;;  %v1106_v58 = vmul.f32 %v3481_v41, %v3481_v41  ;;  %v3900_v41 = vld [vmem:[#allocation25_spill] sm:$0xff] }
 0x240   :  { %v3492_v20 = vsub.f32 %v3080_v25, %v952_v9  ;;  %v3495_v46 = vsub.f32 %v3056_v10, %v951_v62  ;;  %v1281_v30 = vsel %vm727_vm1, %v1105_v49, 0.0  ;;  %v1284_v11 = vsel %vm727_vm1, %v1106_v58, 0.0 }
 0x241   :  { %v919_v59 = vpop.xlane.xlu1 %918  ;;  %1189 = vadd.xlane.f32.xlu1 %v1188_v56  ;;  %1282 = vadd.xlane.f32.xlu0 %v1281_v30  ;;  %v916_v23 = vpop.xlane.xlu0 %915  ;;  %v3898_v56 = vld [vmem:[#allocation27_spill] sm:$0xff] }
 0x242   :  { %3896 = vst [vmem:[#allocation34_spill] sm:$0xff] %v3492_v20  ;;  %3897 = vst [vmem:[#allocation35_spill] sm:$0xff] %v3495_v46  ;;  %v1079_v5 = vmul.f32 %v3495_v46, %v3495_v46  ;;  %v1080_v10 = vmul.f32 %v3492_v20, %v3492_v20  ;;  %v984_v62 = vmul.f32 0.0625, %v919_v59  ;;  %v983_v49 = vmul.f32 0.0625, %v916_v23  ;;  %v3902_v23 = vld [vmem:[#allocation26_spill] sm:$0xff] }
 0x244   :  { %v1203_v25 = vsel %vm727_vm1, %v1079_v5, 0.0  ;;  %v1206_v58 = vsel %vm727_vm1, %v1080_v10, 0.0 }
 0x245   :  { %v817_v1 = vpop.xlane.xlu1 %816  ;;  %1285 = vadd.xlane.f32.xlu1 %v1284_v11  ;;  %1204 = vadd.xlane.f32.xlu0 %v1203_v25  ;;  %v814_v6 = vpop.xlane.xlu0 %813  ;;  %v3518_v25 = vsub.f32 %v3902_v23, %v984_v62 }
 0x246   :  { %v950_v38 = vmul.f32 0.0625, %v817_v1  ;;  %v949_v9 = vmul.f32 0.0625, %v814_v6  ;;  %v3904_v1 = vld [vmem:[#allocation24_spill] sm:$0xff] }
 0x247   :  { %3903 = vst [vmem:[#allocation26_spill] sm:$0xff] %v3518_v25  ;;  %v3521_v6 = vsub.f32 %v3904_v1, %v983_v49 }
 0x248   :  { %v3507_v30 = vsub.f32 %v3898_v56, %v950_v38  ;;  %v3510_v46 = vsub.f32 %v3900_v41, %v949_v9  ;;  %v3906_v41 = vld [vmem:[#allocation28_spill] sm:$0xff] }
 0x249   :  { %v913_v5 = vpop.xlane.xlu1 %912  ;;  %1207 = vadd.xlane.f32.xlu1 %v1206_v58  ;;  %v910_v7 = vpop.xlane.xlu0 %909  ;;  %3905 = vst [vmem:[#allocation24_spill] sm:$0xff] %v3521_v6 }
 0x24a   :  { %3899 = vst [vmem:[#allocation27_spill] sm:$0xff] %v3507_v30  ;;  %3901 = vst [vmem:[#allocation25_spill] sm:$0xff] %v3510_v46  ;;  %v982_v20 = vmul.f32 0.0625, %v913_v5  ;;  %v981_v27 = vmul.f32 0.0625, %v910_v7  ;;  %v1078_v11 = vmul.f32 %v3507_v30, %v3507_v30  ;;  %v1077_v59 = vmul.f32 %v3510_v46, %v3510_v46 }
 0x24c   :  { %v3524_v38 = vsub.f32 %v3906_v41, %v982_v20  ;;  %v3527_v10 = vsub.f32 %v3073_v0, %v981_v27  ;;  %v1200_v7 = vsel %vm727_vm1, %v1078_v11, 0.0  ;;  %v1197_v9 = vsel %vm727_vm1, %v1077_v59, 0.0 }
 0x24d   :  { %1201 = vadd.xlane.f32.xlu1 %v1200_v7  ;;  %1198 = vadd.xlane.f32.xlu0 %v1197_v9  ;;  %v1112_v0 = vmul.f32 %v3518_v25, %v3518_v25  ;;  %v1111_v27 = vmul.f32 %v3521_v6, %v3521_v6 }
 0x24e   :  { %3907 = vst [vmem:[#allocation28_spill] sm:$0xff] %v3524_v38  ;;  %3908 = vst [vmem:[#allocation36_spill] sm:$0xff] %v3527_v10  ;;  %v1110_v56 = vmul.f32 %v3524_v38, %v3524_v38  ;;  %v1109_v62 = vmul.f32 %v3527_v10, %v3527_v10 }
 0x24f   :  { %v1302_v58 = vsel %vm727_vm1, %v1112_v0, 0.0  ;;  %v1299_v5 = vsel %vm727_vm1, %v1111_v27, 0.0 }
 0x250   :  { %v1296_v49 = vsel %vm727_vm1, %v1110_v56, 0.0  ;;  %v1293_v20 = vsel %vm727_vm1, %v1109_v62, 0.0 }
 0x251   :  { %1297 = vadd.xlane.f32.xlu1 %v1296_v49  ;;  %1294 = vadd.xlane.f32.xlu0 %v1293_v20 }
 0x255   :  { %1303 = vadd.xlane.f32.xlu1 %v1302_v58  ;;  %1300 = vadd.xlane.f32.xlu0 %v1299_v5 }
 0x262   :  { %v1121_v11 = vpop.xlane.xlu0 %1120 }
 0x263   :  { %v1307_v59 = vmul.f32 0.0625, %v1121_v11 }
 0x265   :  { %v1371_v23 = vadd.f32 1e-06, %v1307_v59 }
 0x266   :  { %v1124_v1 = vpop.xlane.xlu1 %1123  ;;  %v1217_v41 = vpop.xlane.xlu0 %1216 }
 0x267   :  { %2393 = vrsqrt.f32 %v1371_v23  ;;  %v1308_v7 = vmul.f32 0.0625, %v1124_v1  ;;  %v1339_v9 = vmul.f32 0.0625, %v1217_v41  ;;  %v3543_v23 = vld [vmem:[#allocation8] ss:$0 sm:$0xff] }
 0x269   :  { %v1372_v56 = vadd.f32 1e-06, %v1308_v7  ;;  %v1403_v62 = vadd.f32 1e-06, %v1339_v9 }
 0x26a   :  { %v1220_v25 = vpop.xlane.xlu1 %1219  ;;  %v1115_v6 = vpop.xlane.xlu0 %1114 }
 0x26b   :  { %2395 = vrsqrt.f32 %v1372_v56  ;;  %v1340_v49 = vmul.f32 0.0625, %v1220_v25  ;;  %v1305_v20 = vmul.f32 0.0625, %v1115_v6  ;;  %v3546_v25 = vld [vmem:[#allocation10] ss:$0 sm:$0xff] }
 0x26c   :  { %2397 = vrsqrt.f32 %v1403_v62 }
 0x26d   :  { %v1404_v0 = vadd.f32 1e-06, %v1340_v49  ;;  %v1369_v27 = vadd.f32 1e-06, %v1305_v20 }
 0x26e   :  { %v1118_v58 = vpop.xlane.xlu1 %1117  ;;  %v1211_v5 = vpop.xlane.xlu0 %1210 }
 0x26f   :  { %2399 = vrsqrt.f32 %v1404_v0  ;;  %v1306_v11 = vmul.f32 0.0625, %v1118_v58  ;;  %v1337_v59 = vmul.f32 0.0625, %v1211_v5 }
 0x270   :  { %2401 = vrsqrt.f32 %v1369_v27 }
 0x271   :  { %v2394_v10 = vpop.eup %2393  ;;  %v1370_v1 = vadd.f32 1e-06, %v1306_v11  ;;  %v1401_v41 = vadd.f32 1e-06, %v1337_v59  ;;  %v3909_v59 = vld [vmem:[#allocation29_spill] sm:$0xff] }
 0x272   :  { %v1499_v7 = vmul.f32 %v2394_v10, %v3163_v33  ;;  %v1214_v9 = vpop.xlane.xlu1 %1213  ;;  %v1133_v56 = vpop.xlane.xlu0 %1132 }
 0x273   :  { %2403 = vrsqrt.f32 %v1370_v1  ;;  %v1338_v6 = vmul.f32 0.0625, %v1214_v9  ;;  %v1311_v62 = vmul.f32 0.0625, %v1133_v56 }
 0x274   :  { %v1569_v49 = vmul.f32 %v3543_v23, %v1499_v7  ;;  %2405 = vrsqrt.f32 %v1401_v41 }
 0x275   :  { %v2396_v20 = vpop.eup %2395  ;;  %v1402_v0 = vadd.f32 1e-06, %v1338_v6  ;;  %v1375_v27 = vadd.f32 1e-06, %v1311_v62 }
 0x276   :  { %v2398_v58 = vpop.eup %2397  ;;  %v1639_v5 = vadd.f32 %v3546_v25, %v1569_v49  ;;  %v1500_v11 = vmul.f32 %v2396_v20, %v3170_v54  ;;  %v1136_v33 = vpop.xlane.xlu1 %1135 }
 0x277   :  { %v1229_v10 = vpop.xlane.xlu0 %1228  ;;  %v1531_v38 = vmul.f32 %v2398_v58, %v3909_v59  ;;  %2407 = vrsqrt.f32 %v1402_v0  ;;  %v1312_v1 = vmul.f32 0.0625, %v1136_v33 }
 0x278   :  { %v1343_v9 = vmul.f32 0.0625, %v1229_v10  ;;  %v2177_v56 = vpack.c.bf16 %v1639_v5, %v1639_v5  ;;  %v1570_v7 = vmul.f32 %v3543_v23, %v1500_v11  ;;  %2409 = vrsqrt.f32 %v1375_v27 }
 0x279   :  { %v2400_v41 = vpop.eup %2399  ;;  %v1601_v6 = vmul.f32 %v3543_v23, %v1531_v38  ;;  %v1376_v62 = vadd.f32 1e-06, %v1312_v1 }
 0x27a   :  { %v1407_v46 = vadd.f32 1e-06, %v1343_v9  ;;  %v2402_v30 = vpop.eup %2401  ;;  %1960 = vst.msk [vmem:[#allocation11 + $0x8] sm:$0xf] %vm1957_vm2, %v2177_v56  ;;  %v1640_v54 = vadd.f32 %v3546_v25, %v1570_v7  ;;  %v1532_v49 = vmul.f32 %v2400_v41, %v3180_v24  ;;  %v1232_v20 = vpop.xlane.xlu1 %1231 }
 0x27b   :  { %v1127_v0 = vpop.xlane.xlu0 %1126  ;;  %v1671_v58 = vadd.f32 %v3546_v25, %v1601_v6  ;;  %v1497_v5 = vmul.f32 %v2402_v30, %v3173_v26  ;;  %2411 = vrsqrt.f32 %v1376_v62  ;;  %v1344_v27 = vmul.f32 0.0625, %v1232_v20  ;;  %v3910_v6 = vld [vmem:[#allocation30_spill] sm:$0xff] }
 0x27c   :  { %v2178_v11 = vpack.c.bf16 %v1640_v54, %v1640_v54  ;;  %v1602_v38 = vmul.f32 %v3543_v23, %v1532_v49  ;;  %2413 = vrsqrt.f32 %v1407_v46  ;;  %v1309_v33 = vmul.f32 0.0625, %v1127_v0 }
 0x27d   :  { %v2404_v10 = vpop.eup %2403  ;;  %v2209_v59 = vpack.c.bf16 %v1671_v58, %v1671_v58  ;;  %v1567_v1 = vmul.f32 %v3543_v23, %v1497_v5  ;;  %v1408_v9 = vadd.f32 1e-06, %v1344_v27 }
 0x27e   :  { %v2406_v56 = vpop.eup %2405  ;;  %1961 = vst.msk [vmem:[#allocation11 + $0xc] sm:$0xf] %vm1957_vm2, %v2178_v11  ;;  %v1672_v24 = vadd.f32 %v3546_v25, %v1602_v38  ;;  %v1498_v7 = vmul.f32 %v2404_v10, %v3196_v16  ;;  %v1373_v26 = vadd.f32 1e-06, %v1309_v33  ;;  %v1130_v30 = vpop.xlane.xlu1 %1129 }
 0x27f   :  { %v1223_v41 = vpop.xlane.xlu0 %1222  ;;  %1992 = vst.msk [vmem:[#allocation11 + $0x88] sm:$0xf] %vm1957_vm2, %v2209_v59  ;;  %v1637_v46 = vadd.f32 %v3546_v25, %v1567_v1  ;;  %v1529_v62 = vmul.f32 %v2406_v56, %v3910_v6  ;;  %2415 = vrsqrt.f32 %v1408_v9  ;;  %v1310_v54 = vmul.f32 0.0625, %v1130_v30 }
 0x280   :  { %v2210_v49 = vpack.c.bf16 %v1672_v24, %v1672_v24  ;;  %v1568_v20 = vmul.f32 %v3543_v23, %v1498_v7  ;;  %2417 = vrsqrt.f32 %v1373_v26  ;;  %v1341_v0 = vmul.f32 0.0625, %v1223_v41 }
 0x281   :  { %v2408_v58 = vpop.eup %2407  ;;  %v2175_v5 = vpack.c.bf16 %v1637_v46, %v1637_v46  ;;  %v1599_v16 = vmul.f32 %v3543_v23, %v1529_v62  ;;  %v1374_v27 = vadd.f32 1e-06, %v1310_v54 }
 0x282   :  { %v2410_v11 = vpop.eup %2409  ;;  %1993 = vst.msk [vmem:[#allocation11 + $0x8c] sm:$0xf] %vm1957_vm2, %v2210_v49  ;;  %v1638_v38 = vadd.f32 %v3546_v25, %v1568_v20  ;;  %v1530_v33 = vmul.f32 %v2408_v58, %v3193_v50  ;;  %v1405_v10 = vadd.f32 1e-06, %v1341_v0  ;;  %v1226_v59 = vpop.xlane.xlu1 %1225 }
 0x283   :  { %v1145_v1 = vpop.xlane.xlu0 %1144  ;;  %1958 = vst.msk [vmem:[#allocation11] sm:$0xf] %vm1957_vm2, %v2175_v5  ;;  %v1669_v9 = vadd.f32 %v3546_v25, %v1599_v16  ;;  %v1503_v56 = vmul.f32 %v2410_v11, %v3207_v60  ;;  %2419 = vrsqrt.f32 %v1374_v27  ;;  %v1342_v24 = vmul.f32 0.0625, %v1226_v59 }
 0x284   :  { %v2176_v7 = vpack.c.bf16 %v1638_v38, %v1638_v38  ;;  %v1600_v26 = vmul.f32 %v3543_v23, %v1530_v33  ;;  %2421 = vrsqrt.f32 %v1405_v10  ;;  %v1315_v30 = vmul.f32 0.0625, %v1145_v1 }
 0x285   :  { %v2412_v41 = vpop.eup %2411  ;;  %v2207_v46 = vpack.c.bf16 %v1669_v9, %v1669_v9  ;;  %v1573_v50 = vmul.f32 %v3543_v23, %v1503_v56  ;;  %v1406_v6 = vadd.f32 1e-06, %v1342_v24 }
 0x286   :  { %v2414_v62 = vpop.eup %2413  ;;  %1959 = vst.msk [vmem:[#allocation11 + $0x4] sm:$0xf] %vm1957_vm2, %v2176_v7  ;;  %v1670_v54 = vadd.f32 %v3546_v25, %v1600_v26  ;;  %v1504_v49 = vmul.f32 %v2412_v41, %v3204_v61  ;;  %v1379_v60 = vadd.f32 1e-06, %v1315_v30  ;;  %v1148_v20 = vpop.xlane.xlu1 %1147 }
 0x287   :  { %v1241_v0 = vpop.xlane.xlu0 %1240  ;;  %1990 = vst.msk [vmem:[#allocation11 + $0x80] sm:$0xf] %vm1957_vm2, %v2207_v46  ;;  %v1643_v58 = vadd.f32 %v3546_v25, %v1573_v50  ;;  %v1535_v5 = vmul.f32 %v2414_v62, %v3220_v42  ;;  %2423 = vrsqrt.f32 %v1406_v6  ;;  %v1316_v16 = vmul.f32 0.0625, %v1148_v20 }
 0x288   :  { %v2208_v27 = vpack.c.bf16 %v1670_v54, %v1670_v54  ;;  %v1574_v11 = vmul.f32 %v3543_v23, %v1504_v49  ;;  %2425 = vrsqrt.f32 %v1379_v60  ;;  %v1347_v38 = vmul.f32 0.0625, %v1241_v0 }
 0x289   :  { %v2416_v33 = vpop.eup %2415  ;;  %v2181_v10 = vpack.c.bf16 %v1643_v58, %v1643_v58  ;;  %v1605_v61 = vmul.f32 %v3543_v23, %v1535_v5  ;;  %v1380_v59 = vadd.f32 1e-06, %v1316_v16 }
 0x28a   :  { %v2418_v1 = vpop.eup %2417  ;;  %1991 = vst.msk [vmem:[#allocation11 + $0x84] sm:$0xf] %vm1957_vm2, %v2208_v27  ;;  %v1644_v9 = vadd.f32 %v3546_v25, %v1574_v11  ;;  %v1536_v56 = vmul.f32 %v2416_v33, %v3217_v2  ;;  %v1411_v42 = vadd.f32 1e-06, %v1347_v38  ;;  %v1244_v24 = vpop.xlane.xlu1 %1243 }
 0x28b   :  { %v1139_v7 = vpop.xlane.xlu0 %1138  ;;  %1964 = vst.msk [vmem:[#allocation11 + $0x18] sm:$0xf] %vm1957_vm2, %v2181_v10  ;;  %v1675_v26 = vadd.f32 %v3546_v25, %v1605_v61  ;;  %v1501_v30 = vmul.f32 %v2418_v1, %v3231_v12  ;;  %2427 = vrsqrt.f32 %v1380_v59  ;;  %v1348_v41 = vmul.f32 0.0625, %v1244_v24 }
 0x28c   :  { %v2182_v46 = vpack.c.bf16 %v1644_v9, %v1644_v9  ;;  %v1606_v50 = vmul.f32 %v3543_v23, %v1536_v56  ;;  %2429 = vrsqrt.f32 %v1411_v42  ;;  %v1313_v6 = vmul.f32 0.0625, %v1139_v7 }
 0x28d   :  { %v2420_v62 = vpop.eup %2419  ;;  %v2213_v54 = vpack.c.bf16 %v1675_v26, %v1675_v26  ;;  %v1571_v2 = vmul.f32 %v3543_v23, %v1501_v30  ;;  %v1412_v49 = vadd.f32 1e-06, %v1348_v41 }
 0x28e   :  { %v2422_v60 = vpop.eup %2421  ;;  %1965 = vst.msk [vmem:[#allocation11 + $0x1c] sm:$0xf] %vm1957_vm2, %v2182_v46  ;;  %v1676_v20 = vadd.f32 %v3546_v25, %v1606_v50  ;;  %v1502_v0 = vmul.f32 %v2420_v62, %v3228_v13  ;;  %v1377_v12 = vadd.f32 1e-06, %v1313_v6  ;;  %v1142_v58 = vpop.xlane.xlu1 %1141 }
 0x28f   :  { %v1235_v5 = vpop.xlane.xlu0 %1234  ;;  %1996 = vst.msk [vmem:[#allocation11 + $0x98] sm:$0xf] %vm1957_vm2, %v2213_v54  ;;  %v1641_v16 = vadd.f32 %v3546_v25, %v1571_v2  ;;  %v1533_v27 = vmul.f32 %v2422_v60, %v3244_v44  ;;  %2431 = vrsqrt.f32 %v1412_v49  ;;  %v1314_v11 = vmul.f32 0.0625, %v1142_v58 }
 0x290   :  { %v2214_v38 = vpack.c.bf16 %v1676_v20, %v1676_v20  ;;  %v1572_v33 = vmul.f32 %v3543_v23, %v1502_v0  ;;  %2433 = vrsqrt.f32 %v1377_v12  ;;  %v1345_v10 = vmul.f32 0.0625, %v1235_v5 }
 0x291   :  { %v2424_v61 = vpop.eup %2423  ;;  %v2179_v59 = vpack.c.bf16 %v1641_v16, %v1641_v16  ;;  %v1603_v13 = vmul.f32 %v3543_v23, %v1533_v27  ;;  %v1378_v1 = vadd.f32 1e-06, %v1314_v11 }
 0x292   :  { %v2426_v9 = vpop.eup %2425  ;;  %1997 = vst.msk [vmem:[#allocation11 + $0x9c] sm:$0xf] %vm1957_vm2, %v2214_v38  ;;  %v1642_v56 = vadd.f32 %v3546_v25, %v1572_v33  ;;  %v1534_v42 = vmul.f32 %v2424_v61, %v3241_v18  ;;  %v1409_v44 = vadd.f32 1e-06, %v1345_v10  ;;  %v1238_v24 = vpop.xlane.xlu1 %1237 }
 0x293   :  { %v1157_v7 = vpop.xlane.xlu0 %1156  ;;  %1962 = vst.msk [vmem:[#allocation11 + $0x10] sm:$0xf] %vm1957_vm2, %v2179_v59  ;;  %v1673_v26 = vadd.f32 %v3546_v25, %v1603_v13  ;;  %v1507_v30 = vmul.f32 %v2426_v9, %v3255_v28  ;;  %2435 = vrsqrt.f32 %v1378_v1  ;;  %v1346_v41 = vmul.f32 0.0625, %v1238_v24  ;;  %v3911_v1 = vld [vmem:[#allocation31_spill] sm:$0xff]  ;;  %v3912_v24 = vld [vmem:[#allocation16_spill] sm:$0xff] }
 0x294   :  { %v2180_v46 = vpack.c.bf16 %v1642_v56, %v1642_v56  ;;  %v1604_v50 = vmul.f32 %v3543_v23, %v1534_v42  ;;  %2437 = vrsqrt.f32 %v1409_v44  ;;  %v1319_v6 = vmul.f32 0.0625, %v1157_v7 }
 0x295   :  { %v2428_v62 = vpop.eup %2427  ;;  %v2211_v54 = vpack.c.bf16 %v1673_v26, %v1673_v26  ;;  %v1577_v18 = vmul.f32 %v3543_v23, %v1507_v30  ;;  %v1410_v2 = vadd.f32 1e-06, %v1346_v41 }
 0x296   :  { %v2430_v49 = vpop.eup %2429  ;;  %1963 = vst.msk [vmem:[#allocation11 + $0x14] sm:$0xf] %vm1957_vm2, %v2180_v46  ;;  %v1674_v60 = vadd.f32 %v3546_v25, %v1604_v50  ;;  %v1508_v20 = vmul.f32 %v2428_v62, %v3252_v29  ;;  %v1383_v28 = vadd.f32 1e-06, %v1319_v6  ;;  %v1160_v0 = vpop.xlane.xlu1 %1159 }
 0x297   :  { %v1253_v12 = vpop.xlane.xlu0 %1252  ;;  %1994 = vst.msk [vmem:[#allocation11 + $0x90] sm:$0xf] %vm1957_vm2, %v2211_v54  ;;  %v1647_v58 = vadd.f32 %v3546_v25, %v1577_v18  ;;  %v1539_v5 = vmul.f32 %v2430_v49, %v3268_v39  ;;  %2439 = vrsqrt.f32 %v1410_v2  ;;  %v1320_v16 = vmul.f32 0.0625, %v1160_v0  ;;  %v3913_v49 = vld [vmem:[#allocation32_spill] sm:$0xff] }
 0x298   :  { %v2212_v27 = vpack.c.bf16 %v1674_v60, %v1674_v60  ;;  %v1578_v11 = vmul.f32 %v3543_v23, %v1508_v20  ;;  %2441 = vrsqrt.f32 %v1383_v28  ;;  %v1351_v38 = vmul.f32 0.0625, %v1253_v12 }
 0x299   :  { %v2432_v33 = vpop.eup %2431  ;;  %v2185_v10 = vpack.c.bf16 %v1647_v58, %v1647_v58  ;;  %v1609_v29 = vmul.f32 %v3543_v23, %v1539_v5  ;;  %v1384_v61 = vadd.f32 1e-06, %v1320_v16  ;;  %v3914_v58 = vld [vmem:[#allocation17_spill] sm:$0xff] }
 0x29a   :  { %v2434_v59 = vpop.eup %2433  ;;  %1995 = vst.msk [vmem:[#allocation11 + $0x94] sm:$0xf] %vm1957_vm2, %v2212_v27  ;;  %v1648_v13 = vadd.f32 %v3546_v25, %v1578_v11  ;;  %v1540_v9 = vmul.f32 %v2432_v33, %v3911_v1  ;;  %v1415_v39 = vadd.f32 1e-06, %v1351_v38  ;;  %v1256_v56 = vpop.xlane.xlu1 %1255  ;;  %v3915_v1 = vld [vmem:[#allocation18_spill] sm:$0xff] }
 0x29b   :  { %v1151_v42 = vpop.xlane.xlu0 %1150  ;;  %1968 = vst.msk [vmem:[#allocation11 + $0x28] sm:$0xf] %vm1957_vm2, %v2185_v10  ;;  %v1679_v44 = vadd.f32 %v3546_v25, %v1609_v29  ;;  %v1505_v7 = vmul.f32 %v2434_v59, %v3912_v24  ;;  %2443 = vrsqrt.f32 %v1384_v61  ;;  %v1352_v26 = vmul.f32 0.0625, %v1256_v56  ;;  %v3916_v24 = vld [vmem:[#allocation19_spill] sm:$0xff] }
 0x29c   :  { %v2186_v30 = vpack.c.bf16 %v1648_v13, %v1648_v13  ;;  %v1610_v41 = vmul.f32 %v3543_v23, %v1540_v9  ;;  %2445 = vrsqrt.f32 %v1415_v39  ;;  %v1317_v46 = vmul.f32 0.0625, %v1151_v42 }
 0x29d   :  { %v2436_v50 = vpop.eup %2435  ;;  %v2217_v6 = vpack.c.bf16 %v1679_v44, %v1679_v44  ;;  %v1575_v62 = vmul.f32 %v3543_v23, %v1505_v7  ;;  %v1416_v54 = vadd.f32 1e-06, %v1352_v26 }
 0x29e   :  { %v2438_v18 = vpop.eup %2437  ;;  %1969 = vst.msk [vmem:[#allocation11 + $0x2c] sm:$0xf] %vm1957_vm2, %v2186_v30  ;;  %v1680_v2 = vadd.f32 %v3546_v25, %v1610_v41  ;;  %v1506_v60 = vmul.f32 %v2436_v50, %v3913_v49  ;;  %v1381_v20 = vadd.f32 1e-06, %v1317_v46  ;;  %v1154_v28 = vpop.xlane.xlu1 %1153  ;;  %v3917_v49 = vld [vmem:[#allocation20_spill] sm:$0xff] }
 0x29f   :  { %v1247_v0 = vpop.xlane.xlu0 %1246  ;;  %2000 = vst.msk [vmem:[#allocation11 + $0xa8] sm:$0xf] %vm1957_vm2, %v2217_v6  ;;  %v1645_v12 = vadd.f32 %v3546_v25, %v1575_v62  ;;  %v1537_v5 = vmul.f32 %v2438_v18, %v3914_v58  ;;  %2447 = vrsqrt.f32 %v1416_v54  ;;  %v1318_v16 = vmul.f32 0.0625, %v1154_v28 }
 0x2a0   :  { %v2218_v27 = vpack.c.bf16 %v1680_v2, %v1680_v2  ;;  %v1576_v11 = vmul.f32 %v3543_v23, %v1506_v60  ;;  %2449 = vrsqrt.f32 %v1381_v20  ;;  %v1349_v38 = vmul.f32 0.0625, %v1247_v0 }
 0x2a1   :  { %v2440_v33 = vpop.eup %2439  ;;  %v2183_v10 = vpack.c.bf16 %v1645_v12, %v1645_v12  ;;  %v1607_v29 = vmul.f32 %v3543_v23, %v1537_v5  ;;  %v1382_v61 = vadd.f32 1e-06, %v1318_v16 }
 0x2a2   :  { %v2442_v59 = vpop.eup %2441  ;;  %2001 = vst.msk [vmem:[#allocation11 + $0xac] sm:$0xf] %vm1957_vm2, %v2218_v27  ;;  %v1646_v13 = vadd.f32 %v3546_v25, %v1576_v11  ;;  %v1538_v9 = vmul.f32 %v2440_v33, %v3915_v1  ;;  %v1413_v39 = vadd.f32 1e-06, %v1349_v38  ;;  %v1250_v56 = vpop.xlane.xlu1 %1249 }
 0x2a3   :  { %v1169_v42 = vpop.xlane.xlu0 %1168  ;;  %1966 = vst.msk [vmem:[#allocation11 + $0x20] sm:$0xf] %vm1957_vm2, %v2183_v10  ;;  %v1677_v44 = vadd.f32 %v3546_v25, %v1607_v29  ;;  %v1511_v7 = vmul.f32 %v2442_v59, %v3916_v24  ;;  %2451 = vrsqrt.f32 %v1382_v61  ;;  %v1350_v26 = vmul.f32 0.0625, %v1250_v56 }
 0x2a4   :  { %v2184_v30 = vpack.c.bf16 %v1646_v13, %v1646_v13  ;;  %v1608_v41 = vmul.f32 %v3543_v23, %v1538_v9  ;;  %2453 = vrsqrt.f32 %v1413_v39  ;;  %v1323_v46 = vmul.f32 0.0625, %v1169_v42 }
 0x2a5   :  { %v2444_v50 = vpop.eup %2443  ;;  %v2215_v6 = vpack.c.bf16 %v1677_v44, %v1677_v44  ;;  %v1581_v62 = vmul.f32 %v3543_v23, %v1511_v7  ;;  %v1414_v54 = vadd.f32 1e-06, %v1350_v26 }
 0x2a6   :  { %v2446_v18 = vpop.eup %2445  ;;  %1967 = vst.msk [vmem:[#allocation11 + $0x24] sm:$0xf] %vm1957_vm2, %v2184_v30  ;;  %v1678_v2 = vadd.f32 %v3546_v25, %v1608_v41  ;;  %v1512_v60 = vmul.f32 %v2444_v50, %v3917_v49  ;;  %v1387_v20 = vadd.f32 1e-06, %v1323_v46  ;;  %v1172_v28 = vpop.xlane.xlu1 %1171 }
 0x2a7   :  { %v1265_v0 = vpop.xlane.xlu0 %1264  ;;  %1998 = vst.msk [vmem:[#allocation11 + $0xa0] sm:$0xf] %vm1957_vm2, %v2215_v6  ;;  %v1651_v12 = vadd.f32 %v3546_v25, %v1581_v62  ;;  %v1543_v58 = vmul.f32 %v2446_v18, %v3316_v48  ;;  %2455 = vrsqrt.f32 %v1414_v54  ;;  %v1324_v5 = vmul.f32 0.0625, %v1172_v28  ;;  %v3918_v6 = vld [vmem:[#allocation22_spill] sm:$0xff] }
 0x2a8   :  { %v2216_v16 = vpack.c.bf16 %v1678_v2, %v1678_v2  ;;  %v1582_v27 = vmul.f32 %v3543_v23, %v1512_v60  ;;  %2457 = vrsqrt.f32 %v1387_v20  ;;  %v1355_v11 = vmul.f32 0.0625, %v1265_v0 }
 0x2a9   :  { %v2448_v38 = vpop.eup %2447  ;;  %v2189_v33 = vpack.c.bf16 %v1651_v12, %v1651_v12  ;;  %v1613_v10 = vmul.f32 %v3543_v23, %v1543_v58  ;;  %v1388_v29 = vadd.f32 1e-06, %v1324_v5 }
 0x2aa   :  { %v2450_v61 = vpop.eup %2449  ;;  %1999 = vst.msk [vmem:[#allocation11 + $0xa4] sm:$0xf] %vm1957_vm2, %v2216_v16  ;;  %v1652_v59 = vadd.f32 %v3546_v25, %v1582_v27  ;;  %v1544_v13 = vmul.f32 %v2448_v38, %v3313_v34  ;;  %v1419_v48 = vadd.f32 1e-06, %v1355_v11  ;;  %v1268_v1 = vpop.xlane.xlu1 %1267 }
 0x2ab   :  { %v1163_v9 = vpop.xlane.xlu0 %1162  ;;  %1972 = vst.msk [vmem:[#allocation11 + $0x38] sm:$0xf] %vm1957_vm2, %v2189_v33  ;;  %v1683_v39 = vadd.f32 %v3546_v25, %v1613_v10  ;;  %v1509_v56 = vmul.f32 %v2450_v61, %v3327_v19  ;;  %2459 = vrsqrt.f32 %v1388_v29  ;;  %v1356_v42 = vmul.f32 0.0625, %v1268_v1 }
 0x2ac   :  { %v2190_v44 = vpack.c.bf16 %v1652_v59, %v1652_v59  ;;  %v1614_v24 = vmul.f32 %v3543_v23, %v1544_v13  ;;  %2461 = vrsqrt.f32 %v1419_v48  ;;  %v1321_v7 = vmul.f32 0.0625, %v1163_v9 }
 0x2ad   :  { %v2452_v26 = vpop.eup %2451  ;;  %v2221_v30 = vpack.c.bf16 %v1683_v39, %v1683_v39  ;;  %v1579_v34 = vmul.f32 %v3543_v23, %v1509_v56  ;;  %v1420_v41 = vadd.f32 1e-06, %v1356_v42 }
 0x2ae   :  { %v2454_v46 = vpop.eup %2453  ;;  %1973 = vst.msk [vmem:[#allocation11 + $0x3c] sm:$0xf] %vm1957_vm2, %v2190_v44  ;;  %v1684_v50 = vadd.f32 %v3546_v25, %v1614_v24  ;;  %v1510_v62 = vmul.f32 %v2452_v26, %v3918_v6  ;;  %v1385_v19 = vadd.f32 1e-06, %v1321_v7  ;;  %v1166_v54 = vpop.xlane.xlu1 %1165 }
 0x2af   :  { %v1259_v18 = vpop.xlane.xlu0 %1258  ;;  %2004 = vst.msk [vmem:[#allocation11 + $0xb8] sm:$0xf] %vm1957_vm2, %v2221_v30  ;;  %v1649_v2 = vadd.f32 %v3546_v25, %v1579_v34  ;;  %v1541_v49 = vmul.f32 %v2454_v46, %v3340_v45  ;;  %2463 = vrsqrt.f32 %v1420_v41  ;;  %v1322_v60 = vmul.f32 0.0625, %v1166_v54 }
 0x2b0   :  { %v2222_v20 = vpack.c.bf16 %v1684_v50, %v1684_v50  ;;  %v1580_v28 = vmul.f32 %v3543_v23, %v1510_v62  ;;  %2465 = vrsqrt.f32 %v1385_v19  ;;  %v1353_v0 = vmul.f32 0.0625, %v1259_v18 }
 0x2b1   :  { %v2456_v12 = vpop.eup %2455  ;;  %v2187_v58 = vpack.c.bf16 %v1649_v2, %v1649_v2  ;;  %v1611_v5 = vmul.f32 %v3543_v23, %v1541_v49  ;;  %v1386_v16 = vadd.f32 1e-06, %v1322_v60 }
 0x2b2   :  { %v2458_v27 = vpop.eup %2457  ;;  %2005 = vst.msk [vmem:[#allocation11 + $0xbc] sm:$0xf] %vm1957_vm2, %v2222_v20  ;;  %v1650_v11 = vadd.f32 %v3546_v25, %v1580_v28  ;;  %v1542_v38 = vmul.f32 %v2456_v12, %v3337_v21  ;;  %v1417_v45 = vadd.f32 1e-06, %v1353_v0  ;;  %v1262_v33 = vpop.xlane.xlu1 %1261 }
 0x2b3   :  { %v1181_v10 = vpop.xlane.xlu0 %1180  ;;  %1970 = vst.msk [vmem:[#allocation11 + $0x30] sm:$0xf] %vm1957_vm2, %v2187_v58  ;;  %v1681_v29 = vadd.f32 %v3546_v25, %v1611_v5  ;;  %v1515_v61 = vmul.f32 %v2458_v27, %v3351_v32  ;;  %2467 = vrsqrt.f32 %v1386_v16  ;;  %v1354_v59 = vmul.f32 0.0625, %v1262_v33 }
 0x2b4   :  { %v2188_v13 = vpack.c.bf16 %v1650_v11, %v1650_v11  ;;  %v1612_v48 = vmul.f32 %v3543_v23, %v1542_v38  ;;  %2469 = vrsqrt.f32 %v1417_v45  ;;  %v1327_v1 = vmul.f32 0.0625, %v1181_v10 }
 0x2b5   :  { %v2460_v9 = vpop.eup %2459  ;;  %v2219_v39 = vpack.c.bf16 %v1681_v29, %v1681_v29  ;;  %v1585_v21 = vmul.f32 %v3543_v23, %v1515_v61  ;;  %v1418_v56 = vadd.f32 1e-06, %v1354_v59 }
 0x2b6   :  { %v2462_v42 = vpop.eup %2461  ;;  %1971 = vst.msk [vmem:[#allocation11 + $0x34] sm:$0xf] %vm1957_vm2, %v2188_v13  ;;  %v1682_v44 = vadd.f32 %v3546_v25, %v1612_v48  ;;  %v1516_v24 = vmul.f32 %v2460_v9, %v3348_v37  ;;  %v1391_v32 = vadd.f32 1e-06, %v1327_v1  ;;  %v1184_v7 = vpop.xlane.xlu1 %1183 }
 0x2b7   :  { %v1277_v26 = vpop.xlane.xlu0 %1276  ;;  %2002 = vst.msk [vmem:[#allocation11 + $0xb0] sm:$0xf] %vm1957_vm2, %v2219_v39  ;;  %v1655_v30 = vadd.f32 %v3546_v25, %v1585_v21  ;;  %v1547_v34 = vmul.f32 %v2462_v42, %v3364_v3  ;;  %2471 = vrsqrt.f32 %v1418_v56  ;;  %v1328_v41 = vmul.f32 0.0625, %v1184_v7 }
 0x2b8   :  { %v2220_v46 = vpack.c.bf16 %v1682_v44, %v1682_v44  ;;  %v1586_v50 = vmul.f32 %v3543_v23, %v1516_v24  ;;  %2473 = vrsqrt.f32 %v1391_v32  ;;  %v1359_v6 = vmul.f32 0.0625, %v1277_v26 }
 0x2b9   :  { %v2464_v62 = vpop.eup %2463  ;;  %v2193_v19 = vpack.c.bf16 %v1655_v30, %v1655_v30  ;;  %v1617_v37 = vmul.f32 %v3543_v23, %v1547_v34  ;;  %v1392_v54 = vadd.f32 1e-06, %v1328_v41 }
 0x2ba   :  { %v2466_v18 = vpop.eup %2465  ;;  %2003 = vst.msk [vmem:[#allocation11 + $0xb4] sm:$0xf] %vm1957_vm2, %v2220_v46  ;;  %v1656_v2 = vadd.f32 %v3546_v25, %v1586_v50  ;;  %v1548_v49 = vmul.f32 %v2464_v62, %v3361_v43  ;;  %v1423_v3 = vadd.f32 1e-06, %v1359_v6  ;;  %v1280_v60 = vpop.xlane.xlu1 %1279 }
 0x2bb   :  { %v1175_v20 = vpop.xlane.xlu0 %1174  ;;  %1976 = vst.msk [vmem:[#allocation11 + $0x48] sm:$0xf] %vm1957_vm2, %v2193_v19  ;;  %v1687_v28 = vadd.f32 %v3546_v25, %v1617_v37  ;;  %v1513_v0 = vmul.f32 %v2466_v18, %v3375_v47  ;;  %2475 = vrsqrt.f32 %v1392_v54  ;;  %v1360_v12 = vmul.f32 0.0625, %v1280_v60 }
 0x2bc   :  { %v2194_v58 = vpack.c.bf16 %v1656_v2, %v1656_v2  ;;  %v1618_v5 = vmul.f32 %v3543_v23, %v1548_v49  ;;  %2477 = vrsqrt.f32 %v1423_v3  ;;  %v1325_v16 = vmul.f32 0.0625, %v1175_v20 }
 0x2bd   :  { %v2468_v27 = vpop.eup %2467  ;;  %v2225_v11 = vpack.c.bf16 %v1687_v28, %v1687_v28  ;;  %v1583_v43 = vmul.f32 %v3543_v23, %v1513_v0  ;;  %v1424_v38 = vadd.f32 1e-06, %v1360_v12 }
 0x2be   :  { %v2470_v45 = vpop.eup %2469  ;;  %1977 = vst.msk [vmem:[#allocation11 + $0x4c] sm:$0xf] %vm1957_vm2, %v2194_v58  ;;  %v1688_v33 = vadd.f32 %v3546_v25, %v1618_v5  ;;  %v1514_v10 = vmul.f32 %v2468_v27, %v3372_v63  ;;  %v1389_v47 = vadd.f32 1e-06, %v1325_v16  ;;  %v1178_v29 = vpop.xlane.xlu1 %1177 }
 0x2bf   :  { %v1271_v61 = vpop.xlane.xlu0 %1270  ;;  %2008 = vst.msk [vmem:[#allocation11 + $0xc8] sm:$0xf] %vm1957_vm2, %v2225_v11  ;;  %v1653_v59 = vadd.f32 %v3546_v25, %v1583_v43  ;;  %v1545_v13 = vmul.f32 %v2470_v45, %v3388_v36  ;;  %2479 = vrsqrt.f32 %v1424_v38  ;;  %v1326_v48 = vmul.f32 0.0625, %v1178_v29 }
 0x2c0   :  { %v2226_v1 = vpack.c.bf16 %v1688_v33, %v1688_v33  ;;  %v1584_v9 = vmul.f32 %v3543_v23, %v1514_v10  ;;  %2481 = vrsqrt.f32 %v1389_v47  ;;  %v1357_v39 = vmul.f32 0.0625, %v1271_v61 }
 0x2c1   :  { %v2472_v21 = vpop.eup %2471  ;;  %v2191_v56 = vpack.c.bf16 %v1653_v59, %v1653_v59  ;;  %v1615_v63 = vmul.f32 %v3543_v23, %v1545_v13  ;;  %v1390_v42 = vadd.f32 1e-06, %v1326_v48 }
 0x2c2   :  { %v2474_v44 = vpop.eup %2473  ;;  %2009 = vst.msk [vmem:[#allocation11 + $0xcc] sm:$0xf] %vm1957_vm2, %v2226_v1  ;;  %v1654_v24 = vadd.f32 %v3546_v25, %v1584_v9  ;;  %v1546_v32 = vmul.f32 %v2472_v21, %v3385_v53  ;;  %v1421_v36 = vadd.f32 1e-06, %v1357_v39  ;;  %v1274_v7 = vpop.xlane.xlu1 %1273 }
 0x2c3   :  { %v1193_v26 = vpop.xlane.xlu0 %1192  ;;  %1974 = vst.msk [vmem:[#allocation11 + $0x40] sm:$0xf] %vm1957_vm2, %v2191_v56  ;;  %v1685_v30 = vadd.f32 %v3546_v25, %v1615_v63  ;;  %v1519_v34 = vmul.f32 %v2474_v44, %v3399_v55  ;;  %2483 = vrsqrt.f32 %v1390_v42  ;;  %v1358_v41 = vmul.f32 0.0625, %v1274_v7 }
 0x2c4   :  { %v2192_v46 = vpack.c.bf16 %v1654_v24, %v1654_v24  ;;  %v1616_v50 = vmul.f32 %v3543_v23, %v1546_v32  ;;  %2485 = vrsqrt.f32 %v1421_v36  ;;  %v1331_v6 = vmul.f32 0.0625, %v1193_v26 }
 0x2c5   :  { %v2476_v62 = vpop.eup %2475  ;;  %v2223_v19 = vpack.c.bf16 %v1685_v30, %v1685_v30  ;;  %v1589_v53 = vmul.f32 %v3543_v23, %v1519_v34  ;;  %v1422_v37 = vadd.f32 1e-06, %v1358_v41 }
 0x2c6   :  { %v2478_v54 = vpop.eup %2477  ;;  %1975 = vst.msk [vmem:[#allocation11 + $0x44] sm:$0xf] %vm1957_vm2, %v2192_v46  ;;  %v1686_v18 = vadd.f32 %v3546_v25, %v1616_v50  ;;  %v1520_v2 = vmul.f32 %v2476_v62, %v3396_v4  ;;  %v1395_v55 = vadd.f32 1e-06, %v1331_v6  ;;  %v1196_v49 = vpop.xlane.xlu1 %1195 }
 0x2c7   :  { %v1289_v3 = vpop.xlane.xlu0 %1288  ;;  %2006 = vst.msk [vmem:[#allocation11 + $0xc0] sm:$0xf] %vm1957_vm2, %v2223_v19  ;;  %v1659_v60 = vadd.f32 %v3546_v25, %v1589_v53  ;;  %v1551_v20 = vmul.f32 %v2478_v54, %v3412_v51  ;;  %2487 = vrsqrt.f32 %v1422_v37  ;;  %v1332_v28 = vmul.f32 0.0625, %v1196_v49 }
 0x2c8   :  { %v2224_v0 = vpack.c.bf16 %v1686_v18, %v1686_v18  ;;  %v1590_v12 = vmul.f32 %v3543_v23, %v1520_v2  ;;  %2489 = vrsqrt.f32 %v1395_v55  ;;  %v1363_v58 = vmul.f32 0.0625, %v1289_v3 }
 0x2c9   :  { %v2480_v5 = vpop.eup %2479  ;;  %v2197_v16 = vpack.c.bf16 %v1659_v60, %v1659_v60  ;;  %v1621_v4 = vmul.f32 %v3543_v23, %v1551_v20  ;;  %v1396_v27 = vadd.f32 1e-06, %v1332_v28 }
 0x2ca   :  { %v2482_v11 = vpop.eup %2481  ;;  %2007 = vst.msk [vmem:[#allocation11 + $0xc4] sm:$0xf] %vm1957_vm2, %v2224_v0  ;;  %v1660_v43 = vadd.f32 %v3546_v25, %v1590_v12  ;;  %v1552_v38 = vmul.f32 %v2480_v5, %v3409_v15  ;;  %v1427_v51 = vadd.f32 1e-06, %v1363_v58  ;;  %v1292_v45 = vpop.xlane.xlu1 %1291 }
 0x2cb   :  { %v1187_v33 = vpop.xlane.xlu0 %1186  ;;  %1980 = vst.msk [vmem:[#allocation11 + $0x58] sm:$0xf] %vm1957_vm2, %v2197_v16  ;;  %v1691_v10 = vadd.f32 %v3546_v25, %v1621_v4  ;;  %v1517_v47 = vmul.f32 %v2482_v11, %v3423_v8  ;;  %2491 = vrsqrt.f32 %v1396_v27  ;;  %v1364_v29 = vmul.f32 0.0625, %v1292_v45 }
 0x2cc   :  { %v2198_v61 = vpack.c.bf16 %v1660_v43, %v1660_v43  ;;  %v1622_v59 = vmul.f32 %v3543_v23, %v1552_v38  ;;  %2493 = vrsqrt.f32 %v1427_v51  ;;  %v1329_v13 = vmul.f32 0.0625, %v1187_v33 }
 0x2cd   :  { %v2484_v48 = vpop.eup %2483  ;;  %v2229_v1 = vpack.c.bf16 %v1691_v10, %v1691_v10  ;;  %v1587_v15 = vmul.f32 %v3543_v23, %v1517_v47  ;;  %v1428_v9 = vadd.f32 1e-06, %v1364_v29 }
 0x2ce   :  { %v2486_v39 = vpop.eup %2485  ;;  %1981 = vst.msk [vmem:[#allocation11 + $0x5c] sm:$0xf] %vm1957_vm2, %v2198_v61  ;;  %v1692_v21 = vadd.f32 %v3546_v25, %v1622_v59  ;;  %v1518_v56 = vmul.f32 %v2484_v48, %v3420_v17  ;;  %v1393_v8 = vadd.f32 1e-06, %v1329_v13  ;;  %v1190_v63 = vpop.xlane.xlu1 %1189 }
 0x2cf   :  { %v1283_v42 = vpop.xlane.xlu0 %1282  ;;  %2012 = vst.msk [vmem:[#allocation11 + $0xd8] sm:$0xf] %vm1957_vm2, %v2229_v1  ;;  %v1657_v44 = vadd.f32 %v3546_v25, %v1587_v15  ;;  %v1549_v24 = vmul.f32 %v2486_v39, %v3436_v52  ;;  %2495 = vrsqrt.f32 %v1428_v9  ;;  %v1330_v32 = vmul.f32 0.0625, %v1190_v63 }
 0x2d0   :  { %v2230_v36 = vpack.c.bf16 %v1692_v21, %v1692_v21  ;;  %v1588_v7 = vmul.f32 %v3543_v23, %v1518_v56  ;;  %2497 = vrsqrt.f32 %v1393_v8  ;;  %v1361_v26 = vmul.f32 0.0625, %v1283_v42  ;;  %v3756_v21 = vld [vmem:[#allocation10] ss:$0 sm:$0xff] }
 0x2d1   :  { %v2488_v30 = vpop.eup %2487  ;;  %v2195_v34 = vpack.c.bf16 %v1657_v44, %v1657_v44  ;;  %v1619_v17 = vmul.f32 %v3543_v23, %v1549_v24  ;;  %v1394_v41 = vadd.f32 1e-06, %v1330_v32  ;;  %v3920_v24 = vld [vmem:[#allocation33_spill] sm:$0xff] }
 0x2d2   :  { %v2490_v46 = vpop.eup %2489  ;;  %2013 = vst.msk [vmem:[#allocation11 + $0xdc] sm:$0xf] %vm1957_vm2, %v2230_v36  ;;  %v1658_v50 = vadd.f32 %v3546_v25, %v1588_v7  ;;  %v1550_v6 = vmul.f32 %v2488_v30, %v3433_v31  ;;  %v1425_v52 = vadd.f32 1e-06, %v1361_v26  ;;  %v1286_v62 = vpop.xlane.xlu1 %1285 }
 0x2d3   :  { %v1205_v19 = vpop.xlane.xlu0 %1204  ;;  %1978 = vst.msk [vmem:[#allocation11 + $0x50] sm:$0xf] %vm1957_vm2, %v2195_v34  ;;  %v1689_v53 = vadd.f32 %v3546_v25, %v1619_v17  ;;  %v1523_v37 = vmul.f32 %v2490_v46, %v3447_v40  ;;  %2499 = vrsqrt.f32 %v1394_v41  ;;  %v1362_v54 = vmul.f32 0.0625, %v1286_v62 }
 0x2d4   :  { %v2196_v18 = vpack.c.bf16 %v1658_v50, %v1658_v50  ;;  %v1620_v2 = vmul.f32 %v3543_v23, %v1550_v6  ;;  %2501 = vrsqrt.f32 %v1425_v52  ;;  %v1335_v55 = vmul.f32 0.0625, %v1205_v19  ;;  %v3921_v52 = vld [vmem:[#allocation23_spill] sm:$0xff] }
 0x2d5   :  { %v2492_v49 = vpop.eup %2491  ;;  %v2227_v3 = vpack.c.bf16 %v1689_v53, %v1689_v53  ;;  %v1593_v31 = vmul.f32 %v3543_v23, %v1523_v37  ;;  %v1426_v60 = vadd.f32 1e-06, %v1362_v54 }
 0x2d6   :  { %v2494_v20 = vpop.eup %2493  ;;  %1979 = vst.msk [vmem:[#allocation11 + $0x54] sm:$0xf] %vm1957_vm2, %v2196_v18  ;;  %v1690_v28 = vadd.f32 %v3546_v25, %v1620_v2  ;;  %v1524_v0 = vmul.f32 %v2492_v49, %v3444_v57  ;;  %v1399_v40 = vadd.f32 1e-06, %v1335_v55  ;;  %v1208_v12 = vpop.xlane.xlu1 %1207  ;;  %v3922_v18 = vld [vmem:[#allocation35_spill] sm:$0xff] }
 0x2d7   :  { %2010 = vst.msk [vmem:[#allocation11 + $0xd0] sm:$0xf] %vm1957_vm2, %v2227_v3  ;;  %v1663_v58 = vadd.f32 %v3546_v25, %v1593_v31  ;;  %v1555_v5 = vmul.f32 %v2494_v20, %v3460_v35  ;;  %2503 = vrsqrt.f32 %v1426_v60  ;;  %v1336_v16 = vmul.f32 0.0625, %v1208_v12  ;;  %v3923_v12 = vld [vmem:[#allocation34_spill] sm:$0xff] }
 0x2d8   :  { %v2228_v4 = vpack.c.bf16 %v1690_v28, %v1690_v28  ;;  %v1594_v27 = vmul.f32 %v3543_v23, %v1524_v0  ;;  %2505 = vrsqrt.f32 %v1399_v40 }
 0x2d9   :  { %v2496_v11 = vpop.eup %2495  ;;  %v2201_v43 = vpack.c.bf16 %v1663_v58, %v1663_v58  ;;  %v1625_v38 = vmul.f32 %v3543_v23, %v1555_v5  ;;  %v1400_v51 = vadd.f32 1e-06, %v1336_v16  ;;  %v3751_v23 = vld [vmem:[#allocation8] ss:$0 sm:$0xff] }
 0x2da   :  { %v2498_v57 = vpop.eup %2497  ;;  %2011 = vst.msk [vmem:[#allocation11 + $0xd4] sm:$0xf] %vm1957_vm2, %v2228_v4  ;;  %v1664_v45 = vadd.f32 %v3546_v25, %v1594_v27  ;;  %v1556_v33 = vmul.f32 %v2496_v11, %v3457_v14  ;;  %v1202_v10 = vpop.xlane.xlu1 %1201 }
 0x2db   :  { %v1199_v35 = vpop.xlane.xlu0 %1198  ;;  %1984 = vst.msk [vmem:[#allocation11 + $0x68] sm:$0xf] %vm1957_vm2, %v2201_v43  ;;  %v1695_v47 = vadd.f32 %v3546_v25, %v1625_v38  ;;  %v1521_v29 = vmul.f32 %v2498_v57, %v3471_v22  ;;  %2507 = vrsqrt.f32 %v1400_v51  ;;  %v1334_v61 = vmul.f32 0.0625, %v1202_v10  ;;  %v3919_v25 = vld [vmem:[#allocation21_spill] sm:$0xff]  ;;  %v3924_v57 = vld [vmem:[#allocation27_spill] sm:$0xff] }
 0x2dc   :  { %v2202_v59 = vpack.c.bf16 %v1664_v45, %v1664_v45  ;;  %v1626_v13 = vmul.f32 %v3751_v23, %v1556_v33  ;;  %v1333_v48 = vmul.f32 0.0625, %v1199_v35  ;;  %v3925_v33 = vld [vmem:[#allocation25_spill] sm:$0xff] }
 0x2dd   :  { %v2500_v1 = vpop.eup %2499  ;;  %v2233_v15 = vpack.c.bf16 %v1695_v47, %v1695_v47  ;;  %v1591_v14 = vmul.f32 %v3751_v23, %v1521_v29  ;;  %v1398_v9 = vadd.f32 1e-06, %v1334_v61 }
 0x2de   :  { %v2502_v39 = vpop.eup %2501  ;;  %1985 = vst.msk [vmem:[#allocation11 + $0x6c] sm:$0xf] %vm1957_vm2, %v2202_v59  ;;  %v1696_v22 = vadd.f32 %v3756_v21, %v1626_v13  ;;  %v1522_v56 = vmul.f32 %v2500_v1, %v3919_v25  ;;  %v1397_v8 = vadd.f32 1e-06, %v1333_v48  ;;  %v1298_v63 = vpop.xlane.xlu1 %1297  ;;  %v3926_v48 = vld [vmem:[#allocation28_spill] sm:$0xff] }
 0x2df   :  { %v1295_v42 = vpop.xlane.xlu0 %1294  ;;  %2016 = vst.msk [vmem:[#allocation11 + $0xe8] sm:$0xf] %vm1957_vm2, %v2233_v15  ;;  %v1661_v44 = vadd.f32 %v3756_v21, %v1591_v14  ;;  %v1553_v32 = vmul.f32 %v2502_v39, %v3920_v24  ;;  %2509 = vrsqrt.f32 %v1398_v9  ;;  %v1366_v36 = vmul.f32 0.0625, %v1298_v63  ;;  %v3927_v14 = vld [vmem:[#allocation36_spill] sm:$0xff] }
 0x2e0   :  { %v2234_v7 = vpack.c.bf16 %v1696_v22, %v1696_v22  ;;  %v1592_v26 = vmul.f32 %v3751_v23, %v1522_v56  ;;  %2511 = vrsqrt.f32 %v1397_v8  ;;  %v1365_v30 = vmul.f32 0.0625, %v1295_v42 }
 0x2e1   :  { %v2504_v34 = vpop.eup %2503  ;;  %v2199_v17 = vpack.c.bf16 %v1661_v44, %v1661_v44  ;;  %v1623_v41 = vmul.f32 %v3751_v23, %v1553_v32  ;;  %v1430_v46 = vadd.f32 1e-06, %v1366_v36  ;;  %v3928_v44 = vld [vmem:[#allocation26_spill] sm:$0xff]  ;;  %v3929_v36 = vld [vmem:[#allocation24_spill] sm:$0xff] }
 0x2e2   :  { %v2506_v50 = vpop.eup %2505  ;;  %2017 = vst.msk [vmem:[#allocation11 + $0xec] sm:$0xf] %vm1957_vm2, %v2234_v7  ;;  %v1662_v6 = vadd.f32 %v3756_v21, %v1592_v26  ;;  %v1554_v62 = vmul.f32 %v2504_v34, %v3921_v52  ;;  %v1429_v19 = vadd.f32 1e-06, %v1365_v30  ;;  %v1304_v53 = vpop.xlane.xlu1 %1303 }
 0x2e3   :  { %v1301_v37 = vpop.xlane.xlu0 %1300  ;;  %1982 = vst.msk [vmem:[#allocation11 + $0x60] sm:$0xf] %vm1957_vm2, %v2199_v17  ;;  %v1693_v54 = vadd.f32 %v3756_v21, %v1623_v41  ;;  %v1527_v2 = vmul.f32 %v2506_v50, %v3922_v18  ;;  %2513 = vrsqrt.f32 %v1430_v46  ;;  %v1368_v55 = vmul.f32 0.0625, %v1304_v53 }
 0x2e4   :  { %v2200_v49 = vpack.c.bf16 %v1662_v6, %v1662_v6  ;;  %v1624_v3 = vmul.f32 %v3751_v23, %v1554_v62  ;;  %2515 = vrsqrt.f32 %v1429_v19  ;;  %v1367_v31 = vmul.f32 0.0625, %v1301_v37 }
 0x2e5   :  { %v2508_v60 = vpop.eup %2507  ;;  %v2231_v20 = vpack.c.bf16 %v1693_v54, %v1693_v54  ;;  %v1597_v28 = vmul.f32 %v3751_v23, %v1527_v2  ;;  %v1432_v0 = vadd.f32 1e-06, %v1368_v55 }
 0x2e6   :  { %1983 = vst.msk [vmem:[#allocation11 + $0x64] sm:$0xf] %vm1957_vm2, %v2200_v49  ;;  %v1694_v40 = vadd.f32 %v3756_v21, %v1624_v3  ;;  %v1528_v58 = vmul.f32 %v2508_v60, %v3923_v12  ;;  %v1431_v5 = vadd.f32 1e-06, %v1367_v31 }
 0x2e7   :  { %2014 = vst.msk [vmem:[#allocation11 + $0xe0] sm:$0xf] %vm1957_vm2, %v2231_v20  ;;  %v1667_v16 = vadd.f32 %v3756_v21, %v1597_v28  ;;  %2517 = vrsqrt.f32 %v1432_v0 }
 0x2e8   :  { %v2232_v4 = vpack.c.bf16 %v1694_v40, %v1694_v40  ;;  %v1598_v27 = vmul.f32 %v3751_v23, %v1528_v58  ;;  %2519 = vrsqrt.f32 %v1431_v5 }
 0x2e9   :  { %v2510_v11 = vpop.eup %2509  ;;  %v2205_v43 = vpack.c.bf16 %v1667_v16, %v1667_v16 }
 0x2ea   :  { %v2512_v38 = vpop.eup %2511  ;;  %2015 = vst.msk [vmem:[#allocation11 + $0xe4] sm:$0xf] %vm1957_vm2, %v2232_v4  ;;  %v1668_v51 = vadd.f32 %v3756_v21, %v1598_v27  ;;  %v1526_v45 = vmul.f32 %v2510_v11, %v3924_v57 }
 0x2eb   :  { %1988 = vst.msk [vmem:[#allocation11 + $0x78] sm:$0xf] %vm1957_vm2, %v2205_v43  ;;  %v1525_v10 = vmul.f32 %v2512_v38, %v3925_v33 }
 0x2ec   :  { %v2206_v35 = vpack.c.bf16 %v1668_v51, %v1668_v51  ;;  %v1596_v47 = vmul.f32 %v3751_v23, %v1526_v45 }
 0x2ed   :  { %v2514_v29 = vpop.eup %2513  ;;  %v1595_v61 = vmul.f32 %v3751_v23, %v1525_v10 }
 0x2ee   :  { %v2516_v59 = vpop.eup %2515  ;;  %1989 = vst.msk [vmem:[#allocation11 + $0x7c] sm:$0xf] %vm1957_vm2, %v2206_v35  ;;  %v1666_v13 = vadd.f32 %v3756_v21, %v1596_v47  ;;  %v1558_v1 = vmul.f32 %v2514_v29, %v3926_v48 }
 0x2ef   :  { %v1665_v15 = vadd.f32 %v3756_v21, %v1595_v61  ;;  %v1557_v9 = vmul.f32 %v2516_v59, %v3927_v14 }
 0x2f0   :  { %v2204_v39 = vpack.c.bf16 %v1666_v13, %v1666_v13  ;;  %v1628_v22 = vmul.f32 %v3751_v23, %v1558_v1 }
 0x2f1   :  { %v2518_v25 = vpop.eup %2517  ;;  %v2203_v56 = vpack.c.bf16 %v1665_v15, %v1665_v15  ;;  %v1627_v8 = vmul.f32 %v3751_v23, %v1557_v9 }
 0x2f2   :  { %v2520_v63 = vpop.eup %2519  ;;  %1987 = vst.msk [vmem:[#allocation11 + $0x74] sm:$0xf] %vm1957_vm2, %v2204_v39  ;;  %v1698_v42 = vadd.f32 %v3756_v21, %v1628_v22  ;;  %v1560_v24 = vmul.f32 %v2518_v25, %v3928_v44 }
 0x2f3   :  { %1986 = vst.msk [vmem:[#allocation11 + $0x70] sm:$0xf] %vm1957_vm2, %v2203_v56  ;;  %v1697_v32 = vadd.f32 %v3756_v21, %v1627_v8  ;;  %v1559_v7 = vmul.f32 %v2520_v63, %v3929_v36 }
 0x2f4   :  { %v2236_v26 = vpack.c.bf16 %v1698_v42, %v1698_v42  ;;  %v1630_v30 = vmul.f32 %v3751_v23, %v1560_v24 }
 0x2f5   :  { %v2235_v34 = vpack.c.bf16 %v1697_v32, %v1697_v32  ;;  %v1629_v17 = vmul.f32 %v3751_v23, %v1559_v7 }
 0x2f6   :  { %2019 = vst.msk [vmem:[#allocation11 + $0xf4] sm:$0xf] %vm1957_vm2, %v2236_v26  ;;  %v1700_v41 = vadd.f32 %v3756_v21, %v1630_v30 }
 0x2f7   :  { %2018 = vst.msk [vmem:[#allocation11 + $0xf0] sm:$0xf] %vm1957_vm2, %v2235_v34  ;;  %v1699_v46 = vadd.f32 %v3756_v21, %v1629_v17 }
 0x2f8   :  { %v2238_v50 = vpack.c.bf16 %v1700_v41, %v1700_v41 }
 0x2f9   :  { %v2237_v6 = vpack.c.bf16 %v1699_v46, %v1699_v46 }
 0x2fa   :  { %2021 = vst.msk [vmem:[#allocation11 + $0xfc] sm:$0xf] %vm1957_vm2, %v2238_v50 }
 0x2fb   :  { %2020 = vst.msk [vmem:[#allocation11 + $0xf8] sm:$0xf] %vm1957_vm2, %v2237_v6 }
 0x2fc   :  { %2644 = shalt.err (!%p2641_p2)
}
 0x2fd   :  { %s2645_s10 = scalar_lea.hbm %s3827_s5, 4096 }
 0x2fe   :  { %p2646_p3 = scmp.ne.s32.totalorder %s3827_s5, %s2645_s10  ;;  %p2649_p4 = scmp.lt.u32.totalorder %s2645_s10, %s3827_s5 }
 0x300   :  { %p2651_p5 = pnand %p2649_p4, %p2646_p3 }
 0x302   :  { %2654 = shalt.err (!%p2651_p5)
}
 0x303   :  { %2033 = dma.vmem_to_hbm [thread:$0]  %s2028_s3, 4096, %s3827_s5, [#allocation4], %s2665_s30, %s2665_s30, %s2666_s6  }
 0x304   :  { %2661 = dma.done.wait [#allocation4], 4096  }
 0x305   :  { %2662 = vsyncadd [#allocation4], 4294963200 }
 0x306   :  { %2037 = vsyncpa [#allocation3], 1 }
 0x307   :  { %2038 = vsyncpa [#allocation6], 1 }
 0x308   :  { %2039 = vsyncpa [#allocation9], 1 }
 0x309   :  { %2040 = vsyncpa [#allocation4], 1 }

</bundles_post_ra>
